<compile_context>
chip_gen: v7x
topology: tpu7x:2x2x1
jax: 0.10.0
libtpu: 0.0.40
codegen_flags: <defaults>
</compile_context>

<pallas_src>
import functools
import math

import jax
import jax.numpy as jnp
from jax import lax
from jax.experimental import pallas as pl
from jax.experimental.pallas import tpu as pltpu

LN_EPS = 1e-5          # torch.nn.LayerNorm default
LEAKY_SLOPE = 0.01     # F.leaky_relu default negative_slope
NEG_INF = -1e9         # masked_fill value used in the reference module


# ----------------------------- helpers (in-kernel) ---------------------------
def _ln(v, g, b):
    """LayerNorm over last dim (biased variance, like torch)."""
    mu = jnp.mean(v, axis=-1, keepdims=True)
    var = jnp.mean((v - mu) ** 2, axis=-1, keepdims=True)
    return (v - mu) * lax.rsqrt(var + LN_EPS) * g + b


# --------------------- fused full-encoder (all layers) kernel ----------------
def _encoder_stack_kernel(x_ref, m_ref,
                          lnf_g_ref, lnf_b_ref,
                          ln1g_ref, ln1b_ref,
                          wqkv_ref, bqkv_ref,
                          wo_ref, bo_ref,
                          ln2g_ref, ln2b_ref,
                          w1_ref, b1_ref,
                          w2_ref, b2_ref,
                          o_ref,
                          carry_ref,
                          *, n_heads, dim_k):
    l = pl.program_id(1)
    hd = n_heads * dim_k

    # Load the embedded input into the VMEM carry at the first layer only.
    @pl.when(l == 0)
    def _():
        carry_ref[...] = x_ref[...]

    x = carry_ref[...]                                 # (S, D) f32, VMEM-resident

    # Additive attention bias, hoisted out of the per-head loop (one compare +
    # select per grid step instead of H of each).
    bias = jnp.where(m_ref[...] == 0.0, NEG_INF, 0.0)  # (1, S) over key positions

    # ---- sub-layer 1: LN1 -> fused QKV -> attention -> out proj -> residual ----
    xn = _ln(x, ln1g_ref[...], ln1b_ref[...])
    # bf16 MXU operands, f32 accumulation.  1/sqrt(dk) already folded into the
    # Q columns of wqkv/bqkv at init time.
    qkv = jnp.dot(xn.astype(wqkv_ref.dtype), wqkv_ref[...],
                  preferred_element_type=jnp.float32) + bqkv_ref[...]   # (S, 3*hd) f32

    wo = wo_ref[...]                                    # (hd, D) f32 (tiny)
    attn = jnp.zeros(x.shape, jnp.float32)              # (S, D) f32 accumulator
    for h in range(n_heads):                            # static unroll, few live vregs
        q = qkv[:, h * dim_k:(h + 1) * dim_k]                      # (S, dk)
        k = qkv[:, hd + h * dim_k: hd + (h + 1) * dim_k]           # (S, dk)
        v = qkv[:, 2 * hd + h * dim_k: 2 * hd + (h + 1) * dim_k]   # (S, dk)
        # q @ k^T without materializing k.T (transposed contraction).
        s = lax.dot_general(q, k, (((1,), (1,)), ((), ())),
                            preferred_element_type=jnp.float32)     # (S, S)
        s = s + bias
        s = s - jnp.max(s, axis=-1, keepdims=True)
        p = jnp.exp(s)
        p = p / jnp.sum(p, axis=-1, keepdims=True)       # exact softmax divide
        hv = jnp.dot(p, v, preferred_element_type=jnp.float32)      # (S, dk)
        # Accumulate output projection per head (row-sliced wo, 8-aligned rows)
        # instead of lane-axis concatenate + separate matmul.
        attn = attn + jnp.dot(hv, wo[h * dim_k:(h + 1) * dim_k, :],
                              preferred_element_type=jnp.float32)
    attn = attn + bo_ref[...]
    x = x + attn                                       # residual (dropout1 = identity)

    # ---- sub-layer 2: LN2 -> FFW (leaky_relu) -> residual ----
    xn2 = _ln(x, ln2g_ref[...], ln2b_ref[...])
    ff = jnp.dot(xn2.astype(w1_ref.dtype), w1_ref[...],
                 preferred_element_type=jnp.float32) + b1_ref[...]
    ff = jnp.where(ff > 0, ff, LEAKY_SLOPE * ff)       # F.leaky_relu, f32 on VPU
    ff = jnp.dot(ff.astype(w2_ref.dtype), w2_ref[...],
                 preferred_element_type=jnp.float32) + b2_ref[...]
    x = x + ff                                         # residual (dropout2 = identity)

    carry_ref[...] = x                                 # carry to next layer

    # Final LayerNorm fused into the last layer step; single output store.
    @pl.when(l == pl.num_programs(1) - 1)
    def _():
        o_ref[...] = _ln(x, lnf_g_ref[...], lnf_b_ref[...]).astype(o_ref.dtype)


# ------------------------------ Encoder forward ------------------------------
@functools.partial(jax.jit, static_argnums=(3,))
def encoder_forward(params, source_seq, source_mask, n_heads):
    B, S = source_seq.shape
    D = params["wte"].shape[1]
    st = params["stack"]
    L = st["wqkv"].shape[0]
    hd = st["wo"].shape[1]
    dim_k = hd // n_heads
    ffwd = st["w1"].shape[2]

    # Embedding + learned positional encoding (plain JAX gather + add).
    x = jnp.take(params["wte"], source_seq, axis=0)            # (B, S, D)
    x = x + params["wpe"][:S][None, :, :]

    kernel = functools.partial(_encoder_stack_kernel, n_heads=n_heads, dim_k=dim_k)

    const = lambda b, l: (0, 0)           # final LN params (constant)
    per_batch = lambda b, l: (b, 0, 0)    # activations / mask / output
    per_layer = lambda b, l: (l, 0, 0)    # stacked per-layer weights

    out = pl.pallas_call(
        kernel,
        out_shape=jax.ShapeDtypeStruct((B, S, D), jnp.float32),
        grid=(B, L),                      # L innermost: layer loop per batch elem
        in_specs=[
            pl.BlockSpec((None, S, D), per_batch),       # x (embedded input)
            pl.BlockSpec((None, 1, S), per_batch),       # padding mask
            pl.BlockSpec((1, D), const),                 # final ln gamma
            pl.BlockSpec((1, D), const),                 # final ln beta
            pl.BlockSpec((None, 1, D), per_layer),       # ln1 gamma
            pl.BlockSpec((None, 1, D), per_layer),       # ln1 beta
            pl.BlockSpec((None, D, 3 * hd), per_layer),  # wqkv (fused, bf16)
            pl.BlockSpec((None, 1, 3 * hd), per_layer),  # bqkv
            pl.BlockSpec((None, hd, D), per_layer),      # wo
            pl.BlockSpec((None, 1, D), per_layer),       # bo
            pl.BlockSpec((None, 1, D), per_layer),       # ln2 gamma
            pl.BlockSpec((None, 1, D), per_layer),       # ln2 beta
            pl.BlockSpec((None, D, ffwd), per_layer),    # w1 (bf16)
            pl.BlockSpec((None, 1, ffwd), per_layer),    # b1
            pl.BlockSpec((None, ffwd, D), per_layer),    # w2 (bf16)
            pl.BlockSpec((None, 1, D), per_layer),       # b2
        ],
        out_specs=pl.BlockSpec((None, S, D), per_batch),
        scratch_shapes=[pltpu.VMEM((S, D), jnp.float32)],   # running activation
        compiler_params=pltpu.CompilerParams(
            dimension_semantics=("parallel", "arbitrary")),
    )(x, source_mask,
      params["ln_g"], params["ln_b"],
      st["ln1_g"], st["ln1_b"],
      st["wqkv"], st["bqkv"],
      st["wo"], st["bo"],
      st["ln2_g"], st["ln2_b"],
      st["w1"], st["b1"],
      st["w2"], st["b2"])
    return out


# ------------------------------ Param init -----------------------------------
def init_linear_params(key, in_dim, out_dim):
    kw, kb = jax.random.split(key)
    w = jax.random.normal(kw, (in_dim, out_dim), jnp.float32) / math.sqrt(in_dim)
    b = jax.random.normal(kb, (out_dim,), jnp.float32) * 0.01
    return w, b


def init_params(key, voc, emb_dim, n_layers, n_heads, ffwd_dim, max_seq_len=200):
    keys = jax.random.split(key, 2 + n_layers)
    dim_k = emb_dim // n_heads
    hd = dim_k * n_heads
    scale = 1.0 / math.sqrt(dim_k)

    wqkv, bqkv, wo, bo, w1, b1, w2, b2 = ([] for _ in range(8))
    for li in range(n_layers):
        lk = jax.random.split(keys[2 + li], 6)
        wq_, bq_ = init_linear_params(lk[0], emb_dim, hd)
        wk_, bk_ = init_linear_params(lk[1], emb_dim, hd)
        wv_, bv_ = init_linear_params(lk[2], emb_dim, hd)
        wo_, bo_ = init_linear_params(lk[3], hd, emb_dim)
        w1_, b1_ = init_linear_params(lk[4], emb_dim, ffwd_dim)
        w2_, b2_ = init_linear_params(lk[5], ffwd_dim, emb_dim)
        # Q/K/V pre-concatenated; 1/sqrt(dim_k) folded into the Q columns
        # (one-time init cost, removes per-head scale mul from the kernel).
        wqkv.append(jnp.concatenate([wq_ * scale, wk_, wv_], axis=1))
        bqkv.append(jnp.concatenate([bq_ * scale, bk_, bv_], axis=0))
        wo.append(wo_); bo.append(bo_)
        w1.append(w1_); b1.append(b1_)
        w2.append(w2_); b2.append(b2_)

    L = n_layers
    params = {
        "wte": jax.random.normal(keys[0], (voc, emb_dim), jnp.float32) * 0.02,
        "wpe": jax.random.normal(keys[1], (max_seq_len, emb_dim), jnp.float32) * 0.02,
        "ln_g": jnp.ones((1, emb_dim), jnp.float32),
        "ln_b": jnp.zeros((1, emb_dim), jnp.float32),
        "stack": {
            # per-layer weights stacked on a leading L axis for the fused kernel
            "ln1_g": jnp.ones((L, 1, emb_dim), jnp.float32),
            "ln1_b": jnp.zeros((L, 1, emb_dim), jnp.float32),
            "ln2_g": jnp.ones((L, 1, emb_dim), jnp.float32),
            "ln2_b": jnp.zeros((L, 1, emb_dim), jnp.float32),
            "wqkv": jnp.stack(wqkv).astype(jnp.bfloat16),          # (L, D, 3*hd)
            "bqkv": jnp.stack(bqkv).reshape(L, 1, 3 * hd),         # f32
            "wo": jnp.stack(wo),                                   # (L, hd, D) f32
            "bo": jnp.stack(bo).reshape(L, 1, emb_dim),
            "w1": jnp.stack(w1).astype(jnp.bfloat16),              # (L, D, ffwd)
            "b1": jnp.stack(b1).reshape(L, 1, ffwd_dim),
            "w2": jnp.stack(w2).astype(jnp.bfloat16),              # (L, ffwd, D)
            "b2": jnp.stack(b2).reshape(L, 1, emb_dim),
        },
    }
    return params


# ---------------------------------- Main --------------------------------------
if __name__ == "__main__":
    B, S = 2, 8
    EMB_DIM, HEADS, N_LAYERS = 32, 4, 2
    FFWD_DIM = 2048          # nn.Linear(emb_dim, 2048) default in FeedForward
    VOC = 50

    key = jax.random.PRNGKey(0)
    k_param, k_seq = jax.random.split(key)
    params = init_params(k_param, VOC, EMB_DIM, N_LAYERS, HEADS, FFWD_DIM)

    source_seq = jax.random.randint(k_seq, (B, S), 1, VOC, dtype=jnp.int32)
    source_seq = source_seq.at[1, -2:].set(0)                 # pad a couple of tokens
    source_mask = (source_seq != 0).astype(jnp.float32).reshape(B, 1, S)

    out = encoder_forward(params, source_seq, source_mask, HEADS)
    out = jax.block_until_ready(out)

    assert out.shape == (B, S, EMB_DIM)
    assert bool(jnp.all(jnp.isfinite(out)))
    print("KERNEL_OK")
</pallas_src>

<mosaic_0001>
module attributes {stable_mosaic.version = 11 : i64} {
  func.func @_encoder_stack_kernel(%arg0: i32, %arg1: i32, %arg2: memref<1x8x32xf32, #tpu.memory_space<vmem>>, %arg3: memref<1x1x8xf32, #tpu.memory_space<vmem>>, %arg4: memref<1x32xf32, #tpu.memory_space<vmem>>, %arg5: memref<1x32xf32, #tpu.memory_space<vmem>>, %arg6: memref<1x1x32xf32, #tpu.memory_space<vmem>>, %arg7: memref<1x1x32xf32, #tpu.memory_space<vmem>>, %arg8: memref<1x32x96xbf16, #tpu.memory_space<vmem>>, %arg9: memref<1x1x96xf32, #tpu.memory_space<vmem>>, %arg10: memref<1x32x32xf32, #tpu.memory_space<vmem>>, %arg11: memref<1x1x32xf32, #tpu.memory_space<vmem>>, %arg12: memref<1x1x32xf32, #tpu.memory_space<vmem>>, %arg13: memref<1x1x32xf32, #tpu.memory_space<vmem>>, %arg14: memref<1x32x2048xbf16, #tpu.memory_space<vmem>>, %arg15: memref<1x1x2048xf32, #tpu.memory_space<vmem>>, %arg16: memref<1x2048x32xbf16, #tpu.memory_space<vmem>>, %arg17: memref<1x1x32xf32, #tpu.memory_space<vmem>>, %arg18: memref<1x8x32xf32, #tpu.memory_space<vmem>>, %arg19: memref<8x32xf32, #tpu.memory_space<vmem>>) attributes {dimension_semantics = [#tpu.dimension_semantics<parallel>, #tpu.dimension_semantics<arbitrary>], iteration_bounds = array<i64: 2, 2>, scalar_prefetch = 0 : i64, scratch_operands = 1 : i64, tpu.core_type = #tpu.core_type<tc>, window_params = [{transform_indices = @transform_0, window_bounds = array<i64: 1, 8, 32>}, {transform_indices = @transform_1, window_bounds = array<i64: 1, 1, 8>}, {pipeline_mode = #tpu.pipeline_mode<synchronous>, transform_indices = @transform_2, window_bounds = array<i64: 1, 32>}, {pipeline_mode = #tpu.pipeline_mode<synchronous>, transform_indices = @transform_3, window_bounds = array<i64: 1, 32>}, {transform_indices = @transform_4, window_bounds = array<i64: 1, 1, 32>}, {transform_indices = @transform_5, window_bounds = array<i64: 1, 1, 32>}, {transform_indices = @transform_6, window_bounds = array<i64: 1, 32, 96>}, {transform_indices = @transform_7, window_bounds = array<i64: 1, 1, 96>}, {transform_indices = @transform_8, window_bounds = array<i64: 1, 32, 32>}, {transform_indices = @transform_9, window_bounds = array<i64: 1, 1, 32>}, {transform_indices = @transform_10, window_bounds = array<i64: 1, 1, 32>}, {transform_indices = @transform_11, window_bounds = array<i64: 1, 1, 32>}, {transform_indices = @transform_12, window_bounds = array<i64: 1, 32, 2048>}, {transform_indices = @transform_13, window_bounds = array<i64: 1, 1, 2048>}, {transform_indices = @transform_14, window_bounds = array<i64: 1, 2048, 32>}, {transform_indices = @transform_15, window_bounds = array<i64: 1, 1, 32>}, {transform_indices = @transform_16, window_bounds = array<i64: 1, 8, 32>}]} {
    %c0_i32 = arith.constant 0 : i32
    %0 = arith.cmpi eq, %arg1, %c0_i32 : i32
    %1 = arith.extui %0 : i1 to i32
    %c0_i32_0 = arith.constant 0 : i32
    %2 = arith.cmpi ne, %1, %c0_i32_0 : i32
    scf.if %2 {
      %c0_82 = arith.constant 0 : index
      %c0_83 = arith.constant 0 : index
      %c0_84 = arith.constant 0 : index
      %181 = vector.load %arg2[%c0_82, %c0_83, %c0_84] : memref<1x8x32xf32, #tpu.memory_space<vmem>>, vector<1x8x32xf32>
      %182 = vector.shape_cast %181 : vector<1x8x32xf32> to vector<8x32xf32>
      %c0_85 = arith.constant 0 : index
      %c0_86 = arith.constant 0 : index
      %183 = vector.load %arg19[%c0_85, %c0_86] : memref<8x32xf32, #tpu.memory_space<vmem>>, vector<8x32xf32>
      tpu.vector_store %arg19[%c0_85, %c0_86], %182 {strides = array<i32>} : memref<8x32xf32, #tpu.memory_space<vmem>>, vector<8x32xf32>,
    } else {
    }
    %c0 = arith.constant 0 : index
    %c0_1 = arith.constant 0 : index
    %3 = vector.load %arg19[%c0, %c0_1] : memref<8x32xf32, #tpu.memory_space<vmem>>, vector<8x32xf32>
    %c0_2 = arith.constant 0 : index
    %c0_3 = arith.constant 0 : index
    %c0_4 = arith.constant 0 : index
    %4 = vector.load %arg3[%c0_2, %c0_3, %c0_4] : memref<1x1x8xf32, #tpu.memory_space<vmem>>, vector<1x1x8xf32>
    %5 = vector.shape_cast %4 : vector<1x1x8xf32> to vector<1x8xf32>
    %cst = arith.constant 0.000000e+00 : f32
    %6 = vector.broadcast %cst : f32 to vector<1x8xf32>
    %7 = arith.cmpf oeq, %5, %6 : vector<1x8xf32>
    %cst_5 = arith.constant -1.000000e+09 : f32
    %cst_6 = arith.constant 0.000000e+00 : f32
    %8 = vector.broadcast %cst_5 : f32 to vector<1x8xf32>
    %9 = vector.broadcast %cst_6 : f32 to vector<1x8xf32>
    %10 = arith.select %7, %8, %9 : vector<1x8xi1>, vector<1x8xf32>
    %c0_7 = arith.constant 0 : index
    %c0_8 = arith.constant 0 : index
    %c0_9 = arith.constant 0 : index
    %11 = vector.load %arg6[%c0_7, %c0_8, %c0_9] : memref<1x1x32xf32, #tpu.memory_space<vmem>>, vector<1x1x32xf32>
    %12 = vector.shape_cast %11 : vector<1x1x32xf32> to vector<1x32xf32>
    %c0_10 = arith.constant 0 : index
    %c0_11 = arith.constant 0 : index
    %c0_12 = arith.constant 0 : index
    %13 = vector.load %arg7[%c0_10, %c0_11, %c0_12] : memref<1x1x32xf32, #tpu.memory_space<vmem>>, vector<1x1x32xf32>
    %14 = vector.shape_cast %13 : vector<1x1x32xf32> to vector<1x32xf32>
    %cst_13 = arith.constant dense<0.000000e+00> : vector<8xf32>
    %15 = vector.multi_reduction <add>, %3, %cst_13 [1] : vector<8x32xf32> to vector<8xf32>
    %16 = vector.shape_cast %15 : vector<8xf32> to vector<8x1xf32>
    %cst_14 = arith.constant 3.200000e+01 : f32
    %17 = vector.broadcast %cst_14 : f32 to vector<8x1xf32>
    %18 = arith.divf %16, %17 : vector<8x1xf32>
    %19 = vector.broadcast %18 : vector<8x1xf32> to vector<8x32xf32>
    %20 = arith.subf %3, %19 : vector<8x32xf32>
    %21 = arith.mulf %20, %20 : vector<8x32xf32>
    %cst_15 = arith.constant dense<0.000000e+00> : vector<8xf32>
    %22 = vector.multi_reduction <add>, %21, %cst_15 [1] : vector<8x32xf32> to vector<8xf32>
    %23 = vector.shape_cast %22 : vector<8xf32> to vector<8x1xf32>
    %cst_16 = arith.constant 3.200000e+01 : f32
    %24 = vector.broadcast %cst_16 : f32 to vector<8x1xf32>
    %25 = arith.divf %23, %24 : vector<8x1xf32>
    %26 = vector.broadcast %18 : vector<8x1xf32> to vector<8x32xf32>
    %27 = arith.subf %3, %26 : vector<8x32xf32>
    %cst_17 = arith.constant 9.99999974E-6 : f32
    %28 = vector.broadcast %cst_17 : f32 to vector<8x1xf32>
    %29 = arith.addf %25, %28 : vector<8x1xf32>
    %30 = math.rsqrt %29 : vector<8x1xf32>
    %31 = vector.broadcast %30 : vector<8x1xf32> to vector<8x32xf32>
    %32 = arith.mulf %27, %31 : vector<8x32xf32>
    %33 = vector.broadcast %12 : vector<1x32xf32> to vector<8x32xf32>
    %34 = arith.mulf %32, %33 : vector<8x32xf32>
    %35 = vector.broadcast %14 : vector<1x32xf32> to vector<8x32xf32>
    %36 = arith.addf %34, %35 : vector<8x32xf32>
    %37 = arith.truncf %36 : vector<8x32xf32> to vector<8x32xbf16>
    %c0_18 = arith.constant 0 : index
    %c0_19 = arith.constant 0 : index
    %c0_20 = arith.constant 0 : index
    %38 = vector.load %arg8[%c0_18, %c0_19, %c0_20] : memref<1x32x96xbf16, #tpu.memory_space<vmem>>, vector<1x32x96xbf16>
    %39 = vector.shape_cast %38 : vector<1x32x96xbf16> to vector<32x96xbf16>
    %cst_21 = arith.constant dense<0.000000e+00> : vector<8x96xf32>
    %40 = tpu.matmul %37, %39, %cst_21 {dimension_numbers = #tpu.dot_dimension_numbers<[1], [0], [0], [1], [0, 0, 1, 1], [], []>} : vector<8x32xbf16>, vector<32x96xbf16>, vector<8x96xf32> -> vector<8x96xf32>
    %c0_22 = arith.constant 0 : index
    %c0_23 = arith.constant 0 : index
    %c0_24 = arith.constant 0 : index
    %41 = vector.load %arg9[%c0_22, %c0_23, %c0_24] : memref<1x1x96xf32, #tpu.memory_space<vmem>>, vector<1x1x96xf32>
    %42 = vector.shape_cast %41 : vector<1x1x96xf32> to vector<1x96xf32>
    %43 = vector.broadcast %42 : vector<1x96xf32> to vector<8x96xf32>
    %44 = arith.addf %40, %43 : vector<8x96xf32>
    %c0_25 = arith.constant 0 : index
    %c0_26 = arith.constant 0 : index
    %c0_27 = arith.constant 0 : index
    %45 = vector.load %arg10[%c0_25, %c0_26, %c0_27] : memref<1x32x32xf32, #tpu.memory_space<vmem>>, vector<1x32x32xf32>
    %46 = vector.shape_cast %45 : vector<1x32x32xf32> to vector<32x32xf32>
    %cst_28 = arith.constant 0.000000e+00 : f32
    %47 = vector.broadcast %cst_28 : f32 to vector<8x32xf32>
    %48 = vector.extract_strided_slice %44 {offsets = [0, 0], sizes = [8, 8], strides = [1, 1]} : vector<8x96xf32> to vector<8x8xf32>
    %49 = vector.extract_strided_slice %44 {offsets = [0, 32], sizes = [8, 8], strides = [1, 1]} : vector<8x96xf32> to vector<8x8xf32>
    %50 = vector.extract_strided_slice %44 {offsets = [0, 64], sizes = [8, 8], strides = [1, 1]} : vector<8x96xf32> to vector<8x8xf32>
    %cst_29 = arith.constant dense<0.000000e+00> : vector<8x8xf32>
    %51 = tpu.matmul %48, %49, %cst_29 {dimension_numbers = #tpu.dot_dimension_numbers<[1], [1], [0], [0], [0, 0, 1, 0], [], []>} : vector<8x8xf32>, vector<8x8xf32>, vector<8x8xf32> -> vector<8x8xf32>
    %52 = vector.broadcast %10 : vector<1x8xf32> to vector<8x8xf32>
    %53 = arith.addf %51, %52 : vector<8x8xf32>
    %cst_30 = arith.constant dense<0xFF800000> : vector<8xf32>
    %54 = vector.multi_reduction <maximumf>, %53, %cst_30 [1] : vector<8x8xf32> to vector<8xf32>
    %55 = vector.shape_cast %54 : vector<8xf32> to vector<8x1xf32>
    %56 = vector.broadcast %55 : vector<8x1xf32> to vector<8x8xf32>
    %57 = arith.subf %53, %56 : vector<8x8xf32>
    %58 = math.exp %57 : vector<8x8xf32>
    %cst_31 = arith.constant dense<0.000000e+00> : vector<8xf32>
    %59 = vector.multi_reduction <add>, %58, %cst_31 [1] : vector<8x8xf32> to vector<8xf32>
    %60 = vector.shape_cast %59 : vector<8xf32> to vector<8x1xf32>
    %61 = vector.broadcast %60 : vector<8x1xf32> to vector<8x8xf32>
    %62 = arith.divf %58, %61 : vector<8x8xf32>
    %cst_32 = arith.constant dense<0.000000e+00> : vector<8x8xf32>
    %63 = tpu.matmul %62, %50, %cst_32 {dimension_numbers = #tpu.dot_dimension_numbers<[1], [0], [0], [1], [0, 0, 1, 1], [], []>} : vector<8x8xf32>, vector<8x8xf32>, vector<8x8xf32> -> vector<8x8xf32>
    %64 = vector.extract_strided_slice %46 {offsets = [0, 0], sizes = [8, 32], strides = [1, 1]} : vector<32x32xf32> to vector<8x32xf32>
    %cst_33 = arith.constant dense<0.000000e+00> : vector<8x32xf32>
    %65 = tpu.matmul %63, %64, %cst_33 {dimension_numbers = #tpu.dot_dimension_numbers<[1], [0], [0], [1], [0, 0, 1, 1], [], []>} : vector<8x8xf32>, vector<8x32xf32>, vector<8x32xf32> -> vector<8x32xf32>
    %66 = arith.addf %47, %65 : vector<8x32xf32>
    %67 = vector.extract_strided_slice %44 {offsets = [0, 8], sizes = [8, 8], strides = [1, 1]} : vector<8x96xf32> to vector<8x8xf32>
    %68 = vector.extract_strided_slice %44 {offsets = [0, 40], sizes = [8, 8], strides = [1, 1]} : vector<8x96xf32> to vector<8x8xf32>
    %69 = vector.extract_strided_slice %44 {offsets = [0, 72], sizes = [8, 8], strides = [1, 1]} : vector<8x96xf32> to vector<8x8xf32>
    %cst_34 = arith.constant dense<0.000000e+00> : vector<8x8xf32>
    %70 = tpu.matmul %67, %68, %cst_34 {dimension_numbers = #tpu.dot_dimension_numbers<[1], [1], [0], [0], [0, 0, 1, 0], [], []>} : vector<8x8xf32>, vector<8x8xf32>, vector<8x8xf32> -> vector<8x8xf32>
    %71 = vector.broadcast %10 : vector<1x8xf32> to vector<8x8xf32>
    %72 = arith.addf %70, %71 : vector<8x8xf32>
    %cst_35 = arith.constant dense<0xFF800000> : vector<8xf32>
    %73 = vector.multi_reduction <maximumf>, %72, %cst_35 [1] : vector<8x8xf32> to vector<8xf32>
    %74 = vector.shape_cast %73 : vector<8xf32> to vector<8x1xf32>
    %75 = vector.broadcast %74 : vector<8x1xf32> to vector<8x8xf32>
    %76 = arith.subf %72, %75 : vector<8x8xf32>
    %77 = math.exp %76 : vector<8x8xf32>
    %cst_36 = arith.constant dense<0.000000e+00> : vector<8xf32>
    %78 = vector.multi_reduction <add>, %77, %cst_36 [1] : vector<8x8xf32> to vector<8xf32>
    %79 = vector.shape_cast %78 : vector<8xf32> to vector<8x1xf32>
    %80 = vector.broadcast %79 : vector<8x1xf32> to vector<8x8xf32>
    %81 = arith.divf %77, %80 : vector<8x8xf32>
    %cst_37 = arith.constant dense<0.000000e+00> : vector<8x8xf32>
    %82 = tpu.matmul %81, %69, %cst_37 {dimension_numbers = #tpu.dot_dimension_numbers<[1], [0], [0], [1], [0, 0, 1, 1], [], []>} : vector<8x8xf32>, vector<8x8xf32>, vector<8x8xf32> -> vector<8x8xf32>
    %83 = vector.extract_strided_slice %46 {offsets = [8, 0], sizes = [8, 32], strides = [1, 1]} : vector<32x32xf32> to vector<8x32xf32>
    %cst_38 = arith.constant dense<0.000000e+00> : vector<8x32xf32>
    %84 = tpu.matmul %82, %83, %cst_38 {dimension_numbers = #tpu.dot_dimension_numbers<[1], [0], [0], [1], [0, 0, 1, 1], [], []>} : vector<8x8xf32>, vector<8x32xf32>, vector<8x32xf32> -> vector<8x32xf32>
    %85 = arith.addf %66, %84 : vector<8x32xf32>
    %86 = vector.extract_strided_slice %44 {offsets = [0, 16], sizes = [8, 8], strides = [1, 1]} : vector<8x96xf32> to vector<8x8xf32>
    %87 = vector.extract_strided_slice %44 {offsets = [0, 48], sizes = [8, 8], strides = [1, 1]} : vector<8x96xf32> to vector<8x8xf32>
    %88 = vector.extract_strided_slice %44 {offsets = [0, 80], sizes = [8, 8], strides = [1, 1]} : vector<8x96xf32> to vector<8x8xf32>
    %cst_39 = arith.constant dense<0.000000e+00> : vector<8x8xf32>
    %89 = tpu.matmul %86, %87, %cst_39 {dimension_numbers = #tpu.dot_dimension_numbers<[1], [1], [0], [0], [0, 0, 1, 0], [], []>} : vector<8x8xf32>, vector<8x8xf32>, vector<8x8xf32> -> vector<8x8xf32>
    %90 = vector.broadcast %10 : vector<1x8xf32> to vector<8x8xf32>
    %91 = arith.addf %89, %90 : vector<8x8xf32>
    %cst_40 = arith.constant dense<0xFF800000> : vector<8xf32>
    %92 = vector.multi_reduction <maximumf>, %91, %cst_40 [1] : vector<8x8xf32> to vector<8xf32>
    %93 = vector.shape_cast %92 : vector<8xf32> to vector<8x1xf32>
    %94 = vector.broadcast %93 : vector<8x1xf32> to vector<8x8xf32>
    %95 = arith.subf %91, %94 : vector<8x8xf32>
    %96 = math.exp %95 : vector<8x8xf32>
    %cst_41 = arith.constant dense<0.000000e+00> : vector<8xf32>
    %97 = vector.multi_reduction <add>, %96, %cst_41 [1] : vector<8x8xf32> to vector<8xf32>
    %98 = vector.shape_cast %97 : vector<8xf32> to vector<8x1xf32>
    %99 = vector.broadcast %98 : vector<8x1xf32> to vector<8x8xf32>
    %100 = arith.divf %96, %99 : vector<8x8xf32>
    %cst_42 = arith.constant dense<0.000000e+00> : vector<8x8xf32>
    %101 = tpu.matmul %100, %88, %cst_42 {dimension_numbers = #tpu.dot_dimension_numbers<[1], [0], [0], [1], [0, 0, 1, 1], [], []>} : vector<8x8xf32>, vector<8x8xf32>, vector<8x8xf32> -> vector<8x8xf32>
    %102 = vector.extract_strided_slice %46 {offsets = [16, 0], sizes = [8, 32], strides = [1, 1]} : vector<32x32xf32> to vector<8x32xf32>
    %cst_43 = arith.constant dense<0.000000e+00> : vector<8x32xf32>
    %103 = tpu.matmul %101, %102, %cst_43 {dimension_numbers = #tpu.dot_dimension_numbers<[1], [0], [0], [1], [0, 0, 1, 1], [], []>} : vector<8x8xf32>, vector<8x32xf32>, vector<8x32xf32> -> vector<8x32xf32>
    %104 = arith.addf %85, %103 : vector<8x32xf32>
    %105 = vector.extract_strided_slice %44 {offsets = [0, 24], sizes = [8, 8], strides = [1, 1]} : vector<8x96xf32> to vector<8x8xf32>
    %106 = vector.extract_strided_slice %44 {offsets = [0, 56], sizes = [8, 8], strides = [1, 1]} : vector<8x96xf32> to vector<8x8xf32>
    %107 = vector.extract_strided_slice %44 {offsets = [0, 88], sizes = [8, 8], strides = [1, 1]} : vector<8x96xf32> to vector<8x8xf32>
    %cst_44 = arith.constant dense<0.000000e+00> : vector<8x8xf32>
    %108 = tpu.matmul %105, %106, %cst_44 {dimension_numbers = #tpu.dot_dimension_numbers<[1], [1], [0], [0], [0, 0, 1, 0], [], []>} : vector<8x8xf32>, vector<8x8xf32>, vector<8x8xf32> -> vector<8x8xf32>
    %109 = vector.broadcast %10 : vector<1x8xf32> to vector<8x8xf32>
    %110 = arith.addf %108, %109 : vector<8x8xf32>
    %cst_45 = arith.constant dense<0xFF800000> : vector<8xf32>
    %111 = vector.multi_reduction <maximumf>, %110, %cst_45 [1] : vector<8x8xf32> to vector<8xf32>
    %112 = vector.shape_cast %111 : vector<8xf32> to vector<8x1xf32>
    %113 = vector.broadcast %112 : vector<8x1xf32> to vector<8x8xf32>
    %114 = arith.subf %110, %113 : vector<8x8xf32>
    %115 = math.exp %114 : vector<8x8xf32>
    %cst_46 = arith.constant dense<0.000000e+00> : vector<8xf32>
    %116 = vector.multi_reduction <add>, %115, %cst_46 [1] : vector<8x8xf32> to vector<8xf32>
    %117 = vector.shape_cast %116 : vector<8xf32> to vector<8x1xf32>
    %118 = vector.broadcast %117 : vector<8x1xf32> to vector<8x8xf32>
    %119 = arith.divf %115, %118 : vector<8x8xf32>
    %cst_47 = arith.constant dense<0.000000e+00> : vector<8x8xf32>
    %120 = tpu.matmul %119, %107, %cst_47 {dimension_numbers = #tpu.dot_dimension_numbers<[1], [0], [0], [1], [0, 0, 1, 1], [], []>} : vector<8x8xf32>, vector<8x8xf32>, vector<8x8xf32> -> vector<8x8xf32>
    %121 = vector.extract_strided_slice %46 {offsets = [24, 0], sizes = [8, 32], strides = [1, 1]} : vector<32x32xf32> to vector<8x32xf32>
    %cst_48 = arith.constant dense<0.000000e+00> : vector<8x32xf32>
    %122 = tpu.matmul %120, %121, %cst_48 {dimension_numbers = #tpu.dot_dimension_numbers<[1], [0], [0], [1], [0, 0, 1, 1], [], []>} : vector<8x8xf32>, vector<8x32xf32>, vector<8x32xf32> -> vector<8x32xf32>
    %123 = arith.addf %104, %122 : vector<8x32xf32>
    %c0_49 = arith.constant 0 : index
    %c0_50 = arith.constant 0 : index
    %c0_51 = arith.constant 0 : index
    %124 = vector.load %arg11[%c0_49, %c0_50, %c0_51] : memref<1x1x32xf32, #tpu.memory_space<vmem>>, vector<1x1x32xf32>
    %125 = vector.shape_cast %124 : vector<1x1x32xf32> to vector<1x32xf32>
    %126 = vector.broadcast %125 : vector<1x32xf32> to vector<8x32xf32>
    %127 = arith.addf %123, %126 : vector<8x32xf32>
    %128 = arith.addf %3, %127 : vector<8x32xf32>
    %c0_52 = arith.constant 0 : index
    %c0_53 = arith.constant 0 : index
    %c0_54 = arith.constant 0 : index
    %129 = vector.load %arg12[%c0_52, %c0_53, %c0_54] : memref<1x1x32xf32, #tpu.memory_space<vmem>>, vector<1x1x32xf32>
    %130 = vector.shape_cast %129 : vector<1x1x32xf32> to vector<1x32xf32>
    %c0_55 = arith.constant 0 : index
    %c0_56 = arith.constant 0 : index
    %c0_57 = arith.constant 0 : index
    %131 = vector.load %arg13[%c0_55, %c0_56, %c0_57] : memref<1x1x32xf32, #tpu.memory_space<vmem>>, vector<1x1x32xf32>
    %132 = vector.shape_cast %131 : vector<1x1x32xf32> to vector<1x32xf32>
    %cst_58 = arith.constant dense<0.000000e+00> : vector<8xf32>
    %133 = vector.multi_reduction <add>, %128, %cst_58 [1] : vector<8x32xf32> to vector<8xf32>
    %134 = vector.shape_cast %133 : vector<8xf32> to vector<8x1xf32>
    %cst_59 = arith.constant 3.200000e+01 : f32
    %135 = vector.broadcast %cst_59 : f32 to vector<8x1xf32>
    %136 = arith.divf %134, %135 : vector<8x1xf32>
    %137 = vector.broadcast %136 : vector<8x1xf32> to vector<8x32xf32>
    %138 = arith.subf %128, %137 : vector<8x32xf32>
    %139 = arith.mulf %138, %138 : vector<8x32xf32>
    %cst_60 = arith.constant dense<0.000000e+00> : vector<8xf32>
    %140 = vector.multi_reduction <add>, %139, %cst_60 [1] : vector<8x32xf32> to vector<8xf32>
    %141 = vector.shape_cast %140 : vector<8xf32> to vector<8x1xf32>
    %cst_61 = arith.constant 3.200000e+01 : f32
    %142 = vector.broadcast %cst_61 : f32 to vector<8x1xf32>
    %143 = arith.divf %141, %142 : vector<8x1xf32>
    %144 = vector.broadcast %136 : vector<8x1xf32> to vector<8x32xf32>
    %145 = arith.subf %128, %144 : vector<8x32xf32>
    %cst_62 = arith.constant 9.99999974E-6 : f32
    %146 = vector.broadcast %cst_62 : f32 to vector<8x1xf32>
    %147 = arith.addf %143, %146 : vector<8x1xf32>
    %148 = math.rsqrt %147 : vector<8x1xf32>
    %149 = vector.broadcast %148 : vector<8x1xf32> to vector<8x32xf32>
    %150 = arith.mulf %145, %149 : vector<8x32xf32>
    %151 = vector.broadcast %130 : vector<1x32xf32> to vector<8x32xf32>
    %152 = arith.mulf %150, %151 : vector<8x32xf32>
    %153 = vector.broadcast %132 : vector<1x32xf32> to vector<8x32xf32>
    %154 = arith.addf %152, %153 : vector<8x32xf32>
    %155 = arith.truncf %154 : vector<8x32xf32> to vector<8x32xbf16>
    %c0_63 = arith.constant 0 : index
    %c0_64 = arith.constant 0 : index
    %c0_65 = arith.constant 0 : index
    %156 = vector.load %arg14[%c0_63, %c0_64, %c0_65] : memref<1x32x2048xbf16, #tpu.memory_space<vmem>>, vector<1x32x2048xbf16>
    %157 = vector.shape_cast %156 : vector<1x32x2048xbf16> to vector<32x2048xbf16>
    %cst_66 = arith.constant dense<0.000000e+00> : vector<8x2048xf32>
    %158 = tpu.matmul %155, %157, %cst_66 {dimension_numbers = #tpu.dot_dimension_numbers<[1], [0], [0], [1], [0, 0, 1, 1], [], []>} : vector<8x32xbf16>, vector<32x2048xbf16>, vector<8x2048xf32> -> vector<8x2048xf32>
    %c0_67 = arith.constant 0 : index
    %c0_68 = arith.constant 0 : index
    %c0_69 = arith.constant 0 : index
    %159 = vector.load %arg15[%c0_67, %c0_68, %c0_69] : memref<1x1x2048xf32, #tpu.memory_space<vmem>>, vector<1x1x2048xf32>
    %160 = vector.shape_cast %159 : vector<1x1x2048xf32> to vector<1x2048xf32>
    %161 = vector.broadcast %160 : vector<1x2048xf32> to vector<8x2048xf32>
    %162 = arith.addf %158, %161 : vector<8x2048xf32>
    %cst_70 = arith.constant 0.000000e+00 : f32
    %163 = vector.broadcast %cst_70 : f32 to vector<8x2048xf32>
    %164 = arith.cmpf ogt, %162, %163 : vector<8x2048xf32>
    %cst_71 = arith.constant 0.00999999977 : f32
    %165 = vector.broadcast %cst_71 : f32 to vector<8x2048xf32>
    %166 = arith.mulf %165, %162 : vector<8x2048xf32>
    %167 = arith.select %164, %162, %166 : vector<8x2048xi1>, vector<8x2048xf32>
    %168 = arith.truncf %167 : vector<8x2048xf32> to vector<8x2048xbf16>
    %c0_72 = arith.constant 0 : index
    %c0_73 = arith.constant 0 : index
    %c0_74 = arith.constant 0 : index
    %169 = vector.load %arg16[%c0_72, %c0_73, %c0_74] : memref<1x2048x32xbf16, #tpu.memory_space<vmem>>, vector<1x2048x32xbf16>
    %170 = vector.shape_cast %169 : vector<1x2048x32xbf16> to vector<2048x32xbf16>
    %cst_75 = arith.constant dense<0.000000e+00> : vector<8x32xf32>
    %171 = tpu.matmul %168, %170, %cst_75 {dimension_numbers = #tpu.dot_dimension_numbers<[1], [0], [0], [1], [0, 0, 1, 1], [], []>} : vector<8x2048xbf16>, vector<2048x32xbf16>, vector<8x32xf32> -> vector<8x32xf32>
    %c0_76 = arith.constant 0 : index
    %c0_77 = arith.constant 0 : index
    %c0_78 = arith.constant 0 : index
    %172 = vector.load %arg17[%c0_76, %c0_77, %c0_78] : memref<1x1x32xf32, #tpu.memory_space<vmem>>, vector<1x1x32xf32>
    %173 = vector.shape_cast %172 : vector<1x1x32xf32> to vector<1x32xf32>
    %174 = vector.broadcast %173 : vector<1x32xf32> to vector<8x32xf32>
    %175 = arith.addf %171, %174 : vector<8x32xf32>
    %176 = arith.addf %128, %175 : vector<8x32xf32>
    %c0_79 = arith.constant 0 : index
    %c0_80 = arith.constant 0 : index
    %177 = vector.load %arg19[%c0_79, %c0_80] : memref<8x32xf32, #tpu.memory_space<vmem>>, vector<8x32xf32>
    tpu.vector_store %arg19[%c0_79, %c0_80], %176 {strides = array<i32>} : memref<8x32xf32, #tpu.memory_space<vmem>>, vector<8x32xf32>,
    %c1_i32 = arith.constant 1 : i32
    %178 = arith.cmpi eq, %arg1, %c1_i32 : i32
    %179 = arith.extui %178 : i1 to i32
    %c0_i32_81 = arith.constant 0 : i32
    %180 = arith.cmpi ne, %179, %c0_i32_81 : i32
    scf.if %180 {
      %c0_82 = arith.constant 0 : index
      %c0_83 = arith.constant 0 : index
      %181 = vector.load %arg4[%c0_82, %c0_83] : memref<1x32xf32, #tpu.memory_space<vmem>>, vector<1x32xf32>
      %c0_84 = arith.constant 0 : index
      %c0_85 = arith.constant 0 : index
      %182 = vector.load %arg5[%c0_84, %c0_85] : memref<1x32xf32, #tpu.memory_space<vmem>>, vector<1x32xf32>
      %cst_86 = arith.constant dense<0.000000e+00> : vector<8xf32>
      %183 = vector.multi_reduction <add>, %176, %cst_86 [1] : vector<8x32xf32> to vector<8xf32>
      %184 = vector.shape_cast %183 : vector<8xf32> to vector<8x1xf32>
      %cst_87 = arith.constant 3.200000e+01 : f32
      %185 = vector.broadcast %cst_87 : f32 to vector<8x1xf32>
      %186 = arith.divf %184, %185 : vector<8x1xf32>
      %187 = vector.broadcast %186 : vector<8x1xf32> to vector<8x32xf32>
      %188 = arith.subf %176, %187 : vector<8x32xf32>
      %189 = arith.mulf %188, %188 : vector<8x32xf32>
      %cst_88 = arith.constant dense<0.000000e+00> : vector<8xf32>
      %190 = vector.multi_reduction <add>, %189, %cst_88 [1] : vector<8x32xf32> to vector<8xf32>
      %191 = vector.shape_cast %190 : vector<8xf32> to vector<8x1xf32>
      %cst_89 = arith.constant 3.200000e+01 : f32
      %192 = vector.broadcast %cst_89 : f32 to vector<8x1xf32>
      %193 = arith.divf %191, %192 : vector<8x1xf32>
      %194 = vector.broadcast %186 : vector<8x1xf32> to vector<8x32xf32>
      %195 = arith.subf %176, %194 : vector<8x32xf32>
      %cst_90 = arith.constant 9.99999974E-6 : f32
      %196 = vector.broadcast %cst_90 : f32 to vector<8x1xf32>
      %197 = arith.addf %193, %196 : vector<8x1xf32>
      %198 = math.rsqrt %197 : vector<8x1xf32>
      %199 = vector.broadcast %198 : vector<8x1xf32> to vector<8x32xf32>
      %200 = arith.mulf %195, %199 : vector<8x32xf32>
      %201 = vector.broadcast %181 : vector<1x32xf32> to vector<8x32xf32>
      %202 = arith.mulf %200, %201 : vector<8x32xf32>
      %203 = vector.broadcast %182 : vector<1x32xf32> to vector<8x32xf32>
      %204 = arith.addf %202, %203 : vector<8x32xf32>
      %c0_91 = arith.constant 0 : index
      %c0_92 = arith.constant 0 : index
      %c0_93 = arith.constant 0 : index
      %205 = vector.load %arg18[%c0_91, %c0_92, %c0_93] : memref<1x8x32xf32, #tpu.memory_space<vmem>>, vector<1x8x32xf32>
      %206 = vector.shape_cast %205 : vector<1x8x32xf32> to vector<8x32xf32>
      %207 = vector.shape_cast %204 : vector<8x32xf32> to vector<1x8x32xf32>
      tpu.vector_store %arg18[%c0_91, %c0_92, %c0_93], %207 {strides = array<i32>} : memref<1x8x32xf32, #tpu.memory_space<vmem>>, vector<1x8x32xf32>,
    } else {
    }
    return
  }
  func.func @transform_0(%arg0: i32, %arg1: i32) -> (i32, i32, i32) {
    %c0_i32 = arith.constant 0 : i32
    %c0_i32_0 = arith.constant 0 : i32
    %c0_i32_1 = arith.constant 0 : i32
    return %arg0, %c0_i32, %c0_i32_0 : i32, i32, i32
  }
  func.func @transform_1(%arg0: i32, %arg1: i32) -> (i32, i32, i32) {
    %c0_i32 = arith.constant 0 : i32
    %c0_i32_0 = arith.constant 0 : i32
    %c0_i32_1 = arith.constant 0 : i32
    return %arg0, %c0_i32, %c0_i32_0 : i32, i32, i32
  }
  func.func @transform_2(%arg0: i32, %arg1: i32) -> (i32, i32) {
    %c0_i32 = arith.constant 0 : i32
    %c0_i32_0 = arith.constant 0 : i32
    %c0_i32_1 = arith.constant 0 : i32
    return %c0_i32, %c0_i32_0 : i32, i32
  }
  func.func @transform_3(%arg0: i32, %arg1: i32) -> (i32, i32) {
    %c0_i32 = arith.constant 0 : i32
    %c0_i32_0 = arith.constant 0 : i32
    %c0_i32_1 = arith.constant 0 : i32
    return %c0_i32, %c0_i32_0 : i32, i32
  }
  func.func @transform_4(%arg0: i32, %arg1: i32) -> (i32, i32, i32) {
    %c0_i32 = arith.constant 0 : i32
    %c0_i32_0 = arith.constant 0 : i32
    %c0_i32_1 = arith.constant 0 : i32
    return %arg1, %c0_i32, %c0_i32_0 : i32, i32, i32
  }
  func.func @transform_5(%arg0: i32, %arg1: i32) -> (i32, i32, i32) {
    %c0_i32 = arith.constant 0 : i32
    %c0_i32_0 = arith.constant 0 : i32
    %c0_i32_1 = arith.constant 0 : i32
    return %arg1, %c0_i32, %c0_i32_0 : i32, i32, i32
  }
  func.func @transform_6(%arg0: i32, %arg1: i32) -> (i32, i32, i32) {
    %c0_i32 = arith.constant 0 : i32
    %c0_i32_0 = arith.constant 0 : i32
    %c0_i32_1 = arith.constant 0 : i32
    return %arg1, %c0_i32, %c0_i32_0 : i32, i32, i32
  }
  func.func @transform_7(%arg0: i32, %arg1: i32) -> (i32, i32, i32) {
    %c0_i32 = arith.constant 0 : i32
    %c0_i32_0 = arith.constant 0 : i32
    %c0_i32_1 = arith.constant 0 : i32
    return %arg1, %c0_i32, %c0_i32_0 : i32, i32, i32
  }
  func.func @transform_8(%arg0: i32, %arg1: i32) -> (i32, i32, i32) {
    %c0_i32 = arith.constant 0 : i32
    %c0_i32_0 = arith.constant 0 : i32
    %c0_i32_1 = arith.constant 0 : i32
    return %arg1, %c0_i32, %c0_i32_0 : i32, i32, i32
  }
  func.func @transform_9(%arg0: i32, %arg1: i32) -> (i32, i32, i32) {
    %c0_i32 = arith.constant 0 : i32
    %c0_i32_0 = arith.constant 0 : i32
    %c0_i32_1 = arith.constant 0 : i32
    return %arg1, %c0_i32, %c0_i32_0 : i32, i32, i32
  }
  func.func @transform_10(%arg0: i32, %arg1: i32) -> (i32, i32, i32) {
    %c0_i32 = arith.constant 0 : i32
    %c0_i32_0 = arith.constant 0 : i32
    %c0_i32_1 = arith.constant 0 : i32
    return %arg1, %c0_i32, %c0_i32_0 : i32, i32, i32
  }
  func.func @transform_11(%arg0: i32, %arg1: i32) -> (i32, i32, i32) {
    %c0_i32 = arith.constant 0 : i32
    %c0_i32_0 = arith.constant 0 : i32
    %c0_i32_1 = arith.constant 0 : i32
    return %arg1, %c0_i32, %c0_i32_0 : i32, i32, i32
  }
  func.func @transform_12(%arg0: i32, %arg1: i32) -> (i32, i32, i32) {
    %c0_i32 = arith.constant 0 : i32
    %c0_i32_0 = arith.constant 0 : i32
    %c0_i32_1 = arith.constant 0 : i32
    return %arg1, %c0_i32, %c0_i32_0 : i32, i32, i32
  }
  func.func @transform_13(%arg0: i32, %arg1: i32) -> (i32, i32, i32) {
    %c0_i32 = arith.constant 0 : i32
    %c0_i32_0 = arith.constant 0 : i32
    %c0_i32_1 = arith.constant 0 : i32
    return %arg1, %c0_i32, %c0_i32_0 : i32, i32, i32
  }
  func.func @transform_14(%arg0: i32, %arg1: i32) -> (i32, i32, i32) {
    %c0_i32 = arith.constant 0 : i32
    %c0_i32_0 = arith.constant 0 : i32
    %c0_i32_1 = arith.constant 0 : i32
    return %arg1, %c0_i32, %c0_i32_0 : i32, i32, i32
  }
  func.func @transform_15(%arg0: i32, %arg1: i32) -> (i32, i32, i32) {
    %c0_i32 = arith.constant 0 : i32
    %c0_i32_0 = arith.constant 0 : i32
    %c0_i32_1 = arith.constant 0 : i32
    return %arg1, %c0_i32, %c0_i32_0 : i32, i32, i32
  }
  func.func @transform_16(%arg0: i32, %arg1: i32) -> (i32, i32, i32) {
    %c0_i32 = arith.constant 0 : i32
    %c0_i32_0 = arith.constant 0 : i32
    %c0_i32_1 = arith.constant 0 : i32
    return %arg0, %c0_i32, %c0_i32_0 : i32, i32, i32
  }
}

</mosaic_0001>

<bundles_post_ra>
// kernel: encoder_forward.1
= control target key start
LH: loop header
LB: loop body
LE: loop exit
PB: predicated region body
PF: predicated region fallthrough
CT: control target
= control target key end

     0   :  { %s5694_s0 = inlined_call_operand.vmem [shape: f32[2,8,32], index: 0, kind: input, shape index: {}]   ;;  %s5695_s1 = inlined_call_operand.vmem [shape: f32[2,1,8], index: 1, kind: input, shape index: {}]   ;;  %s5696_s2 = inlined_call_operand.vmem [shape: f32[1,32], index: 2, kind: input, shape index: {}]   ;;  %s5697_s3 = inlined_call_operand.vmem [shape: f32[1,32], index: 3, kind: input, shape index: {}]   ;;  %s5698_s4 = inlined_call_operand.vmem [shape: f32[2,1,32], index: 4, kind: input, shape index: {}]   ;;  %s5699_s5 = inlined_call_operand.vmem [shape: f32[2,1,32], index: 5, kind: input, shape index: {}]   ;;  %s5700_s6 = inlined_call_operand.vmem [shape: bf16[2,32,96], index: 6, kind: input, shape index: {}]   ;;  %s5701_s7 = inlined_call_operand.vmem [shape: f32[2,1,96], index: 7, kind: input, shape index: {}]   ;;  %s5702_s8 = inlined_call_operand.vmem [shape: f32[2,32,32], index: 8, kind: input, shape index: {}]   ;;  %s5703_s9 = inlined_call_operand.vmem [shape: f32[2,1,32], index: 9, kind: input, shape index: {}]   ;;  %s5704_s10 = inlined_call_operand.vmem [shape: f32[2,1,32], index: 10, kind: input, shape index: {}]   ;;  %s5705_s11 = inlined_call_operand.vmem [shape: f32[2,1,32], index: 11, kind: input, shape index: {}]   ;;  %s5706_s12 = inlined_call_operand.vmem [shape: bf16[2,32,2048], index: 12, kind: input, shape index: {}]   ;;  %s5707_s13 = inlined_call_operand.vmem [shape: f32[2,1,2048], index: 13, kind: input, shape index: {}]   ;;  %s5708_s14 = inlined_call_operand.vmem [shape: bf16[2,2048,32], index: 14, kind: input, shape index: {}]   ;;  %s5709_s15 = inlined_call_operand.vmem [shape: f32[2,1,32], index: 15, kind: input, shape index: {}]   ;;  %s5710_s16 = inlined_call_operand.hbm [shape: f32[2,8,32], index: 16, kind: output, shape index: {}]  }
   0x1   :  { %5727 = sst [smem:[#allocation20_spill]] %s5694_s0 }
   0x2   :  { %5728 = sst [smem:[#allocation21_spill]] %s5695_s1 }
   0x3   :  { %5729 = sst [smem:[#allocation22_spill]] %s5696_s2 }
   0x4   :  { %5730 = sst [smem:[#allocation23_spill]] %s5697_s3 }
   0x5   :  { %5731 = sst [smem:[#allocation24_spill]] %s5700_s6 }
   0x6   :  { %5732 = sst [smem:[#allocation25_spill]] %s5702_s8 }
   0x7   :  { %5733 = sst [smem:[#allocation26_spill]] %s5705_s11 }
   0x8   :  { %5734 = sst [smem:[#allocation27_spill]] %s5708_s14 }
   0x9   :  { %5735 = sst [smem:[#allocation28_spill]] %s5709_s15 }
   0xa   :  { %5736 = sst [smem:[#allocation29_spill]] %s5710_s16 }
   0xb   :  { %21 = vsyncpa [#allocation4], 0 }
   0xc   :  { %23 = vsyncpa [#allocation4 + $0x1], 0  ;;  %s5051_s21 = smov 0   ;;  %s5053_s22 = smov 0  }
   0xd   :  { %s5055_s23 = smov 0   ;;  %s5057_s24 = smov 0  }
   0xe   :  { %s5059_s25 = smov 0   ;;  %s5061_s26 = smov 0  }
   0xf   :  { %s5063_s27 = smov 0   ;;  %s5065_s28 = smov 0  }
  0x10 LB: > { %5737 = sst [smem:[#allocation6_spill]] %s4921_s21  ;;  %s4125_s29 = sadd.s32 4294967295, %s4949_s28   ;;  %s4949_s28 = sphi %s5065_s28, %s29_s28   ;;  %s4945_s27 = sphi %s5063_s27, %s5790_s27   ;;  %s4941_s26 = sphi %s5061_s26, %s5789_s26   ;;  %s4937_s25 = sphi %s5059_s25, %s5788_s25   ;;  %s4933_s24 = sphi %s5057_s24, %s5787_s24   ;;  %s4929_s23 = sphi %s5055_s23, %s5786_s23   ;;  %s4925_s22 = sphi %s5053_s22, %s5785_s22   ;;  %s4921_s21 = sphi %s5051_s21, %s5784_s21  }
  0x11   : > { %5738 = sst [smem:[#allocation7_spill]] %s4925_s22  ;;  %s4126_s30 = sadd.s32 4294967294, %s4949_s28  }
  0x12   : > { %5739 = sst [smem:[#allocation8_spill]] %s4929_s23  ;;  %s38_s0 = sadd.s32 1, %s4941_s26 }
  0x13   : > { %5740 = sst [smem:[#allocation9_spill]] %s4933_s24  ;;  %p39_p0 = scmp.ge.s32.totalorder %s38_s0, 2 }
  0x14   : > { %5741 = sst [smem:[#allocation10_spill]] %s4937_s25  ;;  %s41_s17 = sadd.s32 1, %s4945_s27 }
  0x15   : > { %5742 = sst [smem:[#allocation11_spill]] %s4941_s26  ;;  %p464_p1 = scmp.ne.s32.totalorder %s4929_s23, %s4925_s22 }
  0x16   : > { %5743 = sst [smem:[#allocation12_spill]] %s4945_s27  ;;  %p465_p2 = scmp.eq.s32.totalorder %s4125_s29, 3 }
  0x17   : > { %5744 = sst [smem:[#allocation13_spill]] %s4949_s28  ;;  %s5792_s0 = smov (%p39_p0, %s38_s0), 0 }
  0x18   : > { %5745 = sst [smem:[#allocation14_spill]] %s5792_s0  ;;  %s5794_s17 = smov (!%p39_p0, %s41_s17), %s4945_s27 }
  0x19   : > { %p5100_p3 = por %p465_p2, %p464_p1  ;;  %p470_p4 = scmp.ne.s32.totalorder %s4925_s22, %s4921_s21 }
  0x1a   : > { %p43_p5 = scmp.ge.s32.totalorder %s5794_s17, 2  ;;  %p471_p6 = scmp.eq.s32.totalorder %s4126_s30, 3 }
  0x1b   : > { %s5746_s18 = scalar_select %p5100_p3, 1, 0 }
  0x1c   : > { %p4129_p7 = scmp.ge.s32.totalorder %s4949_s28, 1  ;;  %p589_p8 = scmp.lt.s32.totalorder %s4949_s28, 5 }
  0x1d   : > { %5747 = sst [smem:[#allocation15_spill]] %s5746_s18  ;;  %s5796_s17 = smov (%p43_p5, %s5794_s17), 0 }
  0x1e   : > { %5748 = sst [smem:[#allocation16_spill]] %s5796_s17  ;;  %p5110_p9 = por %p471_p6, %p470_p4 }
  0x1f   : > { %p590_p10 = pnand %p4129_p7, %p589_p8  ;;  %s451_s20 = ssub.s32 %s4945_s27, %s5796_s17 }
  0x20   : > { %s5749_s19 = scalar_select %p5110_p9, 1, 0 }
  0x21   : > { %s454_s29 = sadd.s32 1, %s4929_s23  ;;  %p452_p11 = scmp.eq.s32.totalorder %s451_s20, 0 }
  0x22   : > { %5750 = sst [smem:[#allocation17_spill]] %s5749_s19  ;;  %593 = sbr.rel (%p590_p10) target bundleno = 4672 (0x1240), region = 84 }
  0x23   : > { %s5118_s0 = scalar_select %p452_p11, %s4929_s23, %s454_s29  }
  0x25   : > { %5751 = sst [smem:[#allocation18_spill]] %s5118_s0 }
  0x29   : > { %s5714_s30 = sand.u32 1, %s4925_s22   ;;  %p686_p12 = scmp.lt.s32.totalorder %s4937_s25, 1 }
  0x2a   : > { %s5124_s26 = sshll.u32 %s5714_s30, 3  ;;  %p693_p13 = scmp.lt.s32.totalorder %s4933_s24, 1 }
  0x2b   : > { %s5128_s19 = scalar_select %p686_p12, %s4937_s25, 1 }
  0x2c   : > { %s5131_s20 = scalar_select %p693_p13, %s4933_s24, 1 }
  0x2d   : > { %5752 = sst [smem:[#allocation19_spill]] %s5128_s19  ;;  %s4131_s29 = sshll.u32 %s5128_s19, 3 }
  0x2e   : > { %s5754_s21 = sld [smem:[#allocation20_spill]]  ;;  %s4343_s24 = sshll.u32 %s5131_s20, 4 }
  0x2f   : > { %s5755_s6 = sld [smem:[#allocation24_spill]]  ;;  %s5756_s8 = sld [smem:[#allocation25_spill]] }
  0x30   : > { %s4345_s27 = sshll.u32 %s5131_s20, 8  ;;  %s5186_s22 = scalar_lea.vmem %s5707_s13, %s4343_s24 }
  0x31   : > { %s5181_s19 = scalar_lea.vmem %s5706_s12, %s4345_s27  ;;  %s5758_s2 = sld [smem:[#allocation28_spill]] }
  0x32   : > { %s685_s1 = scalar_lea.vmem [#allocation3], %s5124_s26  ;;  %s5760_s11 = sld [smem:[#allocation9_spill]] }
  0x34   : > { %s689_s28 = scalar_lea.vmem %s5754_s21, %s4131_s29  ;;  %s4344_s21 = sshll.u32 %s5131_s20, 5 }
  0x35   : > { %s5153_s17 = scalar_lea.vmem %s5755_s6, %s4343_s24  ;;  %s5167_s3 = scalar_lea.vmem %s5756_s8, %s4344_s21 }
  0x36   : > { %s4346_s21 = sshll.u32 %s5131_s20, 10  ;;  %s5759_s6 = sld [smem:[#allocation27_spill]] }
  0x37   : > { %s737_s25 = scalar_lea.vmem %s5758_s2, %s5131_s20 }
  0x38   : > { %p4141_p0 = scmp.ne.s32.totalorder %s5760_s11, 0 }
  0x39   : > { %v743_v0 = vld [vmem:[%s689_s28] sm:$0xff] (!%p4141_p0)  ;;  %vm744_vm0 = vcmask (!%p4141_p0), 261120  }
  0x3a   : > { %742 = sbr.rel (%p4141_p0) target bundleno = 65 (0x41), region = 88  ;;  %745 = vst.msk [vmem:[#allocation2] sm:$0xff] (!%p4141_p0), %vm744_vm0, %v743_v0 }
  0x3c   : > { %s5196_s15 = scalar_lea.vmem %s5759_s6, %s4346_s21 }
  0x41 PF: > { %v5200_v1 = vld [vmem:[#allocation2] sm:$0xff]  ;;  %vm752_vm1 = vcmask 261120   ;;  %v4951_v9 = vmov 0.0   ;;  %vm4952_vm2 = vmmov 0   ;;  %v4704_v10 = vld [vmem:[%s5153_s17 + $0x8] sm:$0xff]   ;;  %s5761_s24 = scalar_lea.vmem %s5698_s4, %s5131_s20  ;;  %s5762_s23 = scalar_lea.vmem %s5699_s5, %s5131_s20  ;;  %vm861_vm3 = vcmask 64512  }
  0x42   : > { %v753_v2 = vsel %vm752_vm1, %v5200_v1, 0.0  ;;  %v4703_v8 = vld [vmem:[%s5153_s17] sm:$0xff]   ;;  %4550 = vmatprep.subr.bf16.mxu0 %v4951_v9  ;;  %4554 = vmatprep.mubr.msk.bf16.mxu0 %vm4952_vm2, %v4951_v9  ;;  %s5763_s27 = scalar_lea.vmem %s5701_s7, %s5131_s20  ;;  %s4953_s30 = smov 64   ;;  %v853_v29 = vlaneseq  ;;  %v849_v61 = vld [vmem:[%s5167_s3 + $0x8] sm:$0xff] }
  0x43   : > { %754 = vadd.xlane.f32.xlu0 %v753_v2  ;;  %4551 = vmatpush3.bf16.msra.mxu0 %v4703_v8  ;;  %v4142_v15 = vld [vmem:[%s5761_s24] ss:$0 sm:$0xff]  ;;  %s5764_s0 = sld [smem:[#allocation19_spill]]  ;;  %s4954_s29 = smov 96  }
  0x44   : > { %4558 = vmatprep.subr.mxu1 %v4951_v9  ;;  %4552 = vmatprep.subr.bf16.mxu0 %v4951_v9  ;;  %v4143_v17 = vld [vmem:[%s5762_s23] ss:$0 sm:$0xff]  ;;  %s4955_s21 = smov 88   ;;  %s5765_s6 = sld [smem:[#allocation21_spill]]  ;;  %v5251_v31 = vshrl.u32 %v853_v29, 7  ;;  %v850_v29 = vld [vmem:[%s5167_s3 + $0x10] sm:$0xff] }
  0x45   : > { %4560 = vmatprep.mubr.msk.f32.mxu1 %vm4952_vm2, %v4951_v9  ;;  %v4144_v21 = vld [vmem:[%s5763_s27] ss:$0 sm:$0xff]  ;;  %s4956_s11 = smov 120   ;;  %s4957_s24 = smov 56  }
  0x46   : > { %v5254_v32 = vsub.s32 0, %v5251_v31  ;;  %s4958_s28 = smov 80   ;;  %s4959_s17 = smov 112   ;;  %v848_v2 = vld [vmem:[%s5167_s3] sm:$0xff] }
  0x47   : > { %4553 = vmatpush3.bf16.msra.mxu0 %v4704_v10  ;;  %s4960_s23 = smov 48   ;;  %s4961_s16 = smov 72  }
  0x48   : > { %4573 = vmatprep.subr.mxu0 %v4951_v9  ;;  %s4962_s14 = smov 104   ;;  %s4963_s27 = smov 40  }
  0x49   : > { %s5768_s18 = scalar_lea.vmem %s5704_s10, %s5131_s20 }
  0x4a   : > { %s5766_s8 = scalar_lea.vmem %s5765_s6, %s5764_s0 }
  0x4b   : > { %v747_v30 = vld [vmem:[%s5766_s8] sm:$0x1]  ;;  %s5769_s8 = sld [smem:[#allocation26_spill]] }
  0x4c   : > { %vm748_vm4 = vcmp.eq.f32.partialorder %v747_v30, 0.0 }
  0x4d   : > { %v749_v33 = vsel %vm748_vm4, -1e+09, %v4951_v9 }
  0x4e   : > { %v5258_v34 = vrot.slane %v749_v33, %v5254_v32 }
  0xd0   : > { %v755_v3 = vpop.xlane.xlu0 %754 }
  0xd1   : > { %v757_v4 = vmul.f32 0.03125, %v755_v3 }
  0xd3   : > { %v758_v5 = vsub.f32 %v5200_v1, %v757_v4 }
  0xd5   : > { %v759_v6 = vmul.f32 %v758_v5, %v758_v5 }
  0xd7   : > { %v760_v7 = vsel %vm752_vm1, %v759_v6, 0.0 }
  0xd8   : > { %761 = vadd.xlane.f32.xlu0 %v760_v7 }
 0x165   : > { %v762_v11 = vpop.xlane.xlu0 %761 }
 0x166   : > { %v763_v12 = vmul.f32 0.03125, %v762_v11 }
 0x168   : > { %v764_v13 = vadd.f32 1e-05, %v763_v12 }
 0x16a   : > { %4833 = vrsqrt.f32 %v764_v13 }
 0x174   : > { %v4834_v14 = vpop.eup %4833 }
 0x175   : > { %v766_v16 = vmul.f32 %v4834_v14, %v758_v5 }
 0x177   : > { %v773_v18 = vmul.f32 %v4142_v15, %v766_v16 }
 0x179   : > { %v780_v19 = vadd.f32 %v4143_v17, %v773_v18 }
 0x17b   : > { %v781_v20 = vpack.c.bf16 %v780_v19, %v780_v19 }
 0x17d   : > { %4555 = vmatmul.mubr.msk.bf16.vlgmr.msra.gmra.mrb[0].mxu0 %vm752_vm1, %v781_v20 }
 0x17e   : > { %4575 = vmatprep.mubr.msk.f32.mxu0 %vm4952_vm2, %v4951_v9 }
 0x250   : > { %v842_v22 = vpop.f32.mrb[0].mxu0 }
 0x251   : > { %v5234_v23 = vadd.f32 %v4144_v21, %v842_v22  ;;  %v4556_v24 = vpop.f32.mrb[1].mxu0 }
 0x252   : > { %v845_v25 = vpop.f32.mrb[2].mxu0 }
 0x253   : > { %947 = vrot.lane.b32.xlu0 %v5234_v23, %s4953_s30  ;;  %859 = vrot.lane.b32.xlu1 %v5234_v23, %s4954_s29  ;;  %v4557_v26 = vpop.f32.mrb[3].mxu0 }
 0x257   : > { %1025 = vrot.lane.b32.xlu0 %v5234_v23, %s4955_s21 }
 0x2c5   : > { %v860_v27 = vpop.permute.xlu1 %859  ;;  %v948_v28 = vpop.permute.xlu0 %947 }
 0x2c6   : > { %4559 = vmatpush3.xpose.msk.msra.mxu1 %vm861_vm3, %v860_v27 }
 0x2c7   : > { %4563 = vmatprep.subr.mxu1 %v4951_v9 }
 0x2c9   : > { %4561 = vmatmul.mubr.msk.f32.vlgmr.msra.gmra.mrb[0].mxu1 %vm861_vm3, %v5234_v23  ;;  %v1026_v44 = vpop.permute.xlu0 %1025 }
 0x2ca   : > { %4564 = vmatpush3.msra.mxu1 %v948_v28  ;;  %4565 = vmatprep.mubr.msk.f32.mxu1 %vm4952_vm2, %v4951_v9 }
 0x2cb   : > { %4568 = vmatprep.subr.mxu1 %v4951_v9 }
 0x39c   : > { %v932_v35 = vpop.f32.mrb[0].mxu1 }
 0x39d   : > { %v933_v36 = vadd.f32 %v932_v35, %v5258_v34  ;;  %v4562_v37 = vpop.f32.mrb[1].mxu1 }
 0x39f   : > { %v936_v38 = vsel %vm861_vm3, %v933_v36, -inf }
 0x3a0   : > { %937 = vmax.xlane.f32.xlu1 %v936_v38 }
 0x42d   : > { %v938_v39 = vpop.xlane.xlu1 %937 }
 0x42e   : > { %v939_v40 = vsub.f32 %v933_v36, %v938_v39 }
 0x430   : > { %v940_v41 = vmul.f32 1.442695, %v939_v40 }
 0x432   : > { %4835 = vpow2.f32 %v940_v41 }
 0x43c   : > { %v4836_v42 = vpop.eup %4835 }
 0x43d   : > { %v942_v43 = vsel %vm861_vm3, %v4836_v42, 0.0 }
 0x43e   : > { %943 = vadd.xlane.f32.xlu0 %v942_v43 }
 0x454   : > { %1023 = vrot.lane.b32.xlu0 %v5234_v23, %s4956_s11  ;;  %s5770_s11 = scalar_lea.vmem %s5769_s8, %s5131_s20 }
 0x4cb   : > { %v944_v45 = vpop.xlane.xlu0 %943 }
 0x4cc   : > { %4837 = vrcp.f32 %v944_v45 }
 0x4cf   : > { %v1024_v48 = vpop.permute.xlu0 %1023 }
 0x4d6   : > { %v4838_v46 = vpop.eup %4837 }
 0x4d7   : > { %v946_v47 = vmul.f32 %v4838_v46, %v4836_v42 }
 0x4d9   : > { %4566 = vmatmul.mubr.msk.f32.vlgmr.msra.gmra.mrb[2].mxu1 %vm861_vm3, %v946_v47 }
 0x4da   : > { %4569 = vmatpush3.xpose.msk.msra.mxu1 %vm861_vm3, %v1026_v44  ;;  %4570 = vmatprep.mubr.msk.f32.mxu1 %vm4952_vm2, %v4951_v9  ;;  %v851_v44 = vld [vmem:[%s5167_s3 + $0x18] sm:$0xff]  ;;  %s5767_s3 = scalar_lea.vmem %s5703_s9, %s5131_s20  ;;  %s5772_s20 = sld [smem:[#allocation9_spill]] }
 0x4db   : > { %4578 = vmatprep.subr.mxu1 %v4951_v9 }
 0x4dd   : > { %4571 = vmatmul.mubr.msk.f32.vlgmr.msra.gmra.mrb[4].mxu1 %vm861_vm3, %v1024_v48 }
 0x4de   : > { %4580 = vmatprep.mubr.msk.f32.mxu1 %vm4952_vm2, %v4951_v9  ;;  %4579 = vmatpush3.msra.mxu1 %v849_v61 }
 0x4df   : > { %4588 = vmatprep.subr.mxu1 %v4951_v9 }
 0x4e0   : > { %p4336_p1 = scmp.ne.s32.totalorder %s5772_s20, 1 }
 0x5ac   : > { %v1019_v49 = vpop.f32.mrb[2].mxu1 }
 0x5ad   : > { %v4567_v50 = vpop.f32.mrb[3].mxu1 }
 0x5b0   : > { %v1097_v51 = vpop.f32.mrb[4].mxu1 }
 0x5b1   : > { %v1098_v52 = vadd.f32 %v1097_v51, %v5258_v34  ;;  %v4572_v53 = vpop.f32.mrb[5].mxu1 }
 0x5b3   : > { %v1101_v54 = vsel %vm861_vm3, %v1098_v52, -inf }
 0x5b4   : > { %1102 = vmax.xlane.f32.xlu1 %v1101_v54 }
 0x5c5   : > { %1112 = vrot.lane.b32.xlu1 %v5234_v23, %s4957_s24 }
 0x5c9   : > { %1336 = vrot.lane.b32.xlu1 %v5234_v23, %s4958_s28  ;;  %s5773_s28 = sld [smem:[#allocation22_spill]] (!%p4336_p1) }
 0x5cd   : > { %1334 = vrot.lane.b32.xlu1 %v5234_v23, %s4959_s17 }
 0x641   : > { %v1103_v55 = vpop.xlane.xlu1 %1102 }
 0x642   : > { %v1104_v56 = vsub.f32 %v1098_v52, %v1103_v55  ;;  %v4164_v52 = vld [vmem:[%s5767_s3] ss:$0 sm:$0xff] }
 0x644   : > { %v1105_v57 = vmul.f32 1.442695, %v1104_v56 }
 0x645   : > { %v1113_v58 = vpop.permute.xlu1 %1112 }
 0x646   : > { %4839 = vpow2.f32 %v1105_v57  ;;  %4574 = vmatpush3.msra.mxu0 %v1113_v58 }
 0x647   : > { %4583 = vmatprep.subr.mxu0 %v4951_v9 }
 0x649   : > { %v1337_v4 = vpop.permute.xlu1 %1336 }
 0x64d   : > { %v1335_v7 = vpop.permute.xlu1 %1334 }
 0x650   : > { %v4840_v59 = vpop.eup %4839 }
 0x651   : > { %v1107_v60 = vsel %vm861_vm3, %v4840_v59, 0.0 }
 0x652   : > { %1108 = vadd.xlane.f32.xlu0 %v1107_v60 }
 0x668   : > { %1423 = vrot.lane.b32.xlu0 %v5234_v23, %s4960_s23 }
 0x66c   : > { %1575 = vrot.lane.b32.xlu0 %v5234_v23, %s4961_s16  ;;  %s5774_s16 = sld [smem:[#allocation23_spill]] (!%p4336_p1) }
 0x6df   : > { %v1109_v62 = vpop.xlane.xlu0 %1108 }
 0x6e0   : > { %4841 = vrcp.f32 %v1109_v62 }
 0x6e3   : > { %v1424_v3 = vpop.permute.xlu0 %1423 }
 0x6e7   : > { %v1576_v24 = vpop.permute.xlu0 %1575 }
 0x6ea   : > { %v4842_v63 = vpop.eup %4841 }
 0x6eb   : > { %v1111_v0 = vmul.f32 %v4842_v63, %v4840_v59  ;;  %v1851_v63 = vld [vmem:[%s5181_s19] sm:$0xff] }
 0x6ed   : > { %4576 = vmatmul.mubr.msk.f32.vlgmr.msra.gmra.mrb[4].mxu0 %vm861_vm3, %v1111_v0  ;;  %v1859_v0 = vld [vmem:[%s5181_s19 + $0x40] sm:$0xff] }
 0x6ee   : > { %4584 = vmatpush3.msra.mxu0 %v848_v2  ;;  %4585 = vmatprep.mubr.msk.f32.mxu0 %vm4952_vm2, %v4951_v9  ;;  %v4168_v2 = vcombine.high %v1851_v63, %v1859_v0 }
 0x6ef   : > { %4593 = vmatprep.subr.mxu0 %v4951_v9 }
 0x6f1   : > { %4586 = vmatmul.mubr.msk.f32.vlgmr.msra.gmra.mrb[6].mxu0 %vm861_vm3, %v1019_v49 }
 0x6f2   : > { %4594 = vmatpush3.msra.mxu0 %v1424_v3  ;;  %4595 = vmatprep.mubr.msk.f32.mxu0 %vm4952_vm2, %v4951_v9  ;;  %v1860_v3 = vld [vmem:[%s5181_s19 + $0x48] sm:$0xff] }
 0x6f3   : > { %4603 = vmatprep.subr.mxu0 %v4951_v9 }
 0x7c0   : > { %v1184_v5 = vpop.f32.mrb[4].mxu0 }
 0x7c1   : > { %v4577_v6 = vpop.f32.mrb[5].mxu0  ;;  %4581 = vmatmul.mubr.msk.f32.vlgmr.msra.gmra.mrb[6].mxu1 %vm861_vm3, %v1184_v5 }
 0x7c2   : > { %4589 = vmatpush3.xpose.msk.msra.mxu1 %vm861_vm3, %v1337_v4  ;;  %4590 = vmatprep.mubr.msk.f32.mxu1 %vm4952_vm2, %v4951_v9  ;;  %v4167_v4 = vcombine.low %v1851_v63, %v1859_v0 }
 0x7c3   : > { %4598 = vmatprep.subr.mxu1 %v4951_v9 }
 0x7c4   : > { %v1330_v8 = vpop.f32.mrb[6].mxu0 }
 0x7c5   : > { %v4587_v10 = vpop.f32.mrb[7].mxu0  ;;  %4591 = vmatmul.mubr.msk.f32.vlgmr.msra.gmra.mrb[8].mxu1 %vm861_vm3, %v1335_v7  ;;  %v1867_v7 = vld [vmem:[%s5181_s19 + $0x80] sm:$0xff] }
 0x7c6   : > { %4600 = vmatprep.mubr.msk.f32.mxu1 %vm4952_vm2, %v4951_v9  ;;  %4599 = vmatpush3.msra.mxu1 %v850_v29  ;;  %v1868_v10 = vld [vmem:[%s5181_s19 + $0x88] sm:$0xff] }
 0x7c7   : > { %4608 = vmatprep.subr.mxu1 %v4951_v9 }
 0x894   : > { %v1257_v11 = vpop.f32.mrb[6].mxu1 }
 0x895   : > { %v1331_v12 = vadd.f32 %v1330_v8, %v1257_v11  ;;  %v4582_v13 = vpop.f32.mrb[7].mxu1  ;;  %v1875_v8 = vld [vmem:[%s5181_s19 + $0xc0] sm:$0xff] }
 0x896   : > { %v4184_v11 = vcombine.high %v1867_v7, %v1875_v8  ;;  %v4183_v13 = vcombine.low %v1867_v7, %v1875_v8 }
 0x898   : > { %v1408_v14 = vpop.f32.mrb[8].mxu1 }
 0x899   : > { %v1409_v15 = vadd.f32 %v1408_v14, %v5258_v34  ;;  %v4592_v16 = vpop.f32.mrb[9].mxu1 }
 0x89a   : > { %v1853_v16 = vld [vmem:[%s5181_s19 + $0x10] sm:$0xff] }
 0x89b   : > { %v1412_v17 = vsel %vm861_vm3, %v1409_v15, -inf }
 0x89c   : > { %1413 = vmax.xlane.f32.xlu1 %v1412_v17  ;;  %v1861_v17 = vld [vmem:[%s5181_s19 + $0x50] sm:$0xff] }
 0x929   : > { %v1414_v18 = vpop.xlane.xlu1 %1413 }
 0x92a   : > { %v1415_v19 = vsub.f32 %v1409_v15, %v1414_v18  ;;  %v1854_v18 = vld [vmem:[%s5181_s19 + $0x18] sm:$0xff] }
 0x92c   : > { %v1416_v20 = vmul.f32 1.442695, %v1415_v19  ;;  %v4964_v19 = vmov 0  }
 0x92e   : > { %4843 = vpow2.f32 %v1416_v20  ;;  %v4172_v20 = vcombine.high %v1853_v16, %v1861_v17 }
 0x938   : > { %v4844_v21 = vpop.eup %4843 }
 0x939   : > { %v1418_v22 = vsel %vm861_vm3, %v4844_v21, 0.0 }
 0x93a   : > { %1419 = vadd.xlane.f32.xlu0 %v1418_v22  ;;  %v4171_v22 = vcombine.low %v1853_v16, %v1861_v17  ;;  %v4707_v16 = vld [vmem:[%s5196_s15] sm:$0xff]  }
 0x93b   : > { %v4708_v17 = vld [vmem:[%s5196_s15 + $0x80] sm:$0xff]  }
 0x950   : > { %1573 = vrot.lane.b32.xlu0 %v5234_v23, %s4962_s14 }
 0x9c7   : > { %v1420_v25 = vpop.xlane.xlu0 %1419 }
 0x9c8   : > { %4845 = vrcp.f32 %v1420_v25 }
 0x9cb   : > { %v1574_v28 = vpop.permute.xlu0 %1573 }
 0x9d2   : > { %v4846_v26 = vpop.eup %4845 }
 0x9d3   : > { %v1422_v27 = vmul.f32 %v4846_v26, %v4844_v21  ;;  %v1862_v21 = vld [vmem:[%s5181_s19 + $0x58] sm:$0xff] }
 0x9d4   : > { %v4174_v25 = vcombine.high %v1854_v18, %v1862_v21 }
 0x9d5   : > { %4596 = vmatmul.mubr.msk.f32.vlgmr.msra.gmra.mrb[8].mxu0 %vm861_vm3, %v1422_v27 }
 0x9d6   : > { %4604 = vmatpush3.xpose.msk.msra.mxu0 %vm861_vm3, %v1576_v24  ;;  %4605 = vmatprep.mubr.msk.f32.mxu0 %vm4952_vm2, %v4951_v9  ;;  %v4173_v24 = vcombine.low %v1854_v18, %v1862_v21  ;;  %v4709_v18 = vld [vmem:[%s5196_s15 + $0x48] sm:$0xff]  }
 0x9d7   : > { %4613 = vmatprep.subr.mxu0 %v4951_v9  ;;  %v4712_v21 = vld [vmem:[%s5196_s15 + $0x88] sm:$0xff]  }
 0x9d9   : > { %4606 = vmatmul.mubr.msk.f32.vlgmr.msra.gmra.mrb[10].mxu0 %vm861_vm3, %v1574_v28 }
 0x9da   : > { %4615 = vmatprep.mubr.msk.f32.mxu0 %vm4952_vm2, %v4951_v9  ;;  %4614 = vmatpush3.msra.mxu0 %v851_v44  ;;  %v1855_v44 = vld [vmem:[%s5181_s19 + $0x20] sm:$0xff] }
 0xaa8   : > { %v1495_v30 = vpop.f32.mrb[8].mxu0 }
 0xaa9   : > { %v4597_v33 = vpop.f32.mrb[9].mxu0  ;;  %4601 = vmatmul.mubr.msk.f32.vlgmr.msra.gmra.mrb[10].mxu1 %vm861_vm3, %v1495_v30  ;;  %v4165_v30 = vld [vmem:[%s5768_s18] ss:$0 sm:$0xff] }
 0xaaa   : > { %4610 = vmatprep.mubr.msk.f32.mxu1 %vm4952_vm2, %v4951_v9 }
 0xaac   : > { %v1647_v35 = vpop.f32.mrb[10].mxu0 }
 0xaad   : > { %v1648_v36 = vadd.f32 %v1647_v35, %v5258_v34  ;;  %v4607_v37 = vpop.f32.mrb[11].mxu0  ;;  %v4166_v35 = vld [vmem:[%s5770_s11] ss:$0 sm:$0xff] }
 0xaae   : > { %v1869_v37 = vld [vmem:[%s5181_s19 + $0x90] sm:$0xff] }
 0xaaf   : > { %v1651_v38 = vsel %vm861_vm3, %v1648_v36, -inf }
 0xab0   : > { %1652 = vmax.xlane.f32.xlu1 %v1651_v38  ;;  %v1877_v38 = vld [vmem:[%s5181_s19 + $0xd0] sm:$0xff] }
 0xac1   : > { %1662 = vrot.lane.b32.xlu1 %v5234_v23, %s4963_s27 }
 0xb3d   : > { %v1653_v39 = vpop.xlane.xlu1 %1652 }
 0xb3e   : > { %v1654_v40 = vsub.f32 %v1648_v36, %v1653_v39  ;;  %v1870_v39 = vld [vmem:[%s5181_s19 + $0x98] sm:$0xff] }
 0xb40   : > { %v1655_v41 = vmul.f32 1.442695, %v1654_v40  ;;  %v1878_v40 = vld [vmem:[%s5181_s19 + $0xd8] sm:$0xff] }
 0xb41   : > { %v1663_v42 = vpop.permute.xlu1 %1662 }
 0xb42   : > { %4847 = vpow2.f32 %v1655_v41  ;;  %4609 = vmatpush3.msra.mxu1 %v1663_v42 }
 0xb43   : > { %2130 = vmatprep.subr.bf16.mxu1 %v4168_v2 }
 0xb4c   : > { %v4848_v43 = vpop.eup %4847 }
 0xb4d   : > { %v1657_v9 = vsel %vm861_vm3, %v4848_v43, 0.0 }
 0xb4e   : > { %1658 = vadd.xlane.f32.xlu0 %v1657_v9  ;;  %v4190_v9 = vcombine.high %v1870_v39, %v1878_v40 }
 0xb7c   : > { %v1568_v34 = vpop.f32.mrb[10].mxu1 }
 0xb7d   : > { %v1572_v45 = vadd.f32 %v1568_v34, %v1331_v12  ;;  %v4602_v46 = vpop.f32.mrb[11].mxu1  ;;  %v1876_v12 = vld [vmem:[%s5181_s19 + $0xc8] sm:$0xff]  ;;  %v1863_v34 = vld [vmem:[%s5181_s19 + $0x60] sm:$0xff] }
 0xb7e   : > { %v4185_v14 = vcombine.low %v1868_v10, %v1876_v12  ;;  %v4186_v15 = vcombine.high %v1868_v10, %v1876_v12  ;;  %v1864_v46 = vld [vmem:[%s5181_s19 + $0x68] sm:$0xff] }
 0xbdb   : > { %v1659_v47 = vpop.xlane.xlu0 %1658 }
 0xbdc   : > { %4849 = vrcp.f32 %v1659_v47  ;;  %v4187_v47 = vcombine.low %v1869_v37, %v1877_v38 }
 0xbe6   : > { %v4850_v48 = vpop.eup %4849 }
 0xbe7   : > { %v1661_v23 = vmul.f32 %v4850_v48, %v4848_v43  ;;  %v4188_v43 = vcombine.high %v1869_v37, %v1877_v38  ;;  %v4189_v48 = vcombine.low %v1870_v39, %v1878_v40  ;;  %v4724_v37 = vld [vmem:[%s5196_s15 + $0xa0] sm:$0xff]   ;;  %v4725_v38 = vld [vmem:[%s5196_s15 + $0x68] sm:$0xff]  }
 0xbe8   : > { %v4726_v39 = vld [vmem:[%s5196_s15 + $0xe8] sm:$0xff]  }
 0xbe9   : > { %4611 = vmatmul.mubr.msk.f32.vlgmr.msra.gmra.mrb[12].mxu1 %vm861_vm3, %v1661_v23  ;;  %v4176_v23 = vcombine.high %v1855_v44, %v1863_v34  ;;  %v4727_v40 = vld [vmem:[%s5196_s15 + $0x28] sm:$0xff]  }
 0xbea   : > { %2131 = vmatpush1.bf16.msra.mxu1 %v4167_v4  ;;  %2162 = vmatprep.mubr.bf16.mxu1 %v4964_v19  ;;  %v1881_v4 = vld [vmem:[%s5181_s19 + $0xf0] sm:$0xff] }
 0xbeb   : > { %2132 = vmatprep.subr.bf16.mxu1 %v4184_v11 }
 0xbee   : > { %2133 = vmatpush1.bf16.msra.mxu1 %v4183_v13 }
 0xbef   : > { %2212 = vmatprep.subr.bf16.mxu1 %v4172_v20  ;;  %v4710_v20 = vld [vmem:[%s5196_s15 + $0xc8] sm:$0xff]  }
 0xcbc   : > { %v1734_v49 = vpop.f32.mrb[12].mxu1 }
 0xcbd   : > { %v4612_v50 = vpop.f32.mrb[13].mxu1  ;;  %4616 = vmatmul.mubr.msk.f32.vlgmr.msra.gmra.mrb[12].mxu0 %vm861_vm3, %v1734_v49 }
 0xcbe   : > { %2203 = vmatprep.mubr.bf16.mxu0 %v4964_v19  ;;  %v1871_v50 = vld [vmem:[%s5181_s19 + $0xa0] sm:$0xff] }
 0xd90   : > { %v1807_v51 = vpop.f32.mrb[12].mxu0 }
 0xd91   : > { %v1811_v53 = vadd.f32 %v1807_v51, %v1572_v45  ;;  %v4617_v54 = vpop.f32.mrb[13].mxu0  ;;  %v1856_v45 = vld [vmem:[%s5181_s19 + $0x28] sm:$0xff]  ;;  %v1879_v51 = vld [vmem:[%s5181_s19 + $0xe0] sm:$0xff] }
 0xd92   : > { %v4178_v49 = vcombine.high %v1856_v45, %v1864_v46  ;;  %v4175_v54 = vcombine.low %v1855_v44, %v1863_v34  ;;  %v4191_v63 = vcombine.low %v1871_v50, %v1879_v51  ;;  %v4732_v44 = vld [vmem:[%s5196_s15 + $0xb0] sm:$0xff]   ;;  %v4733_v34 = vld [vmem:[%s5196_s15 + $0x78] sm:$0xff]  }
 0xd93   : > { %v1819_v55 = vadd.f32 %v4164_v52, %v1811_v53  ;;  %v1872_v52 = vld [vmem:[%s5181_s19 + $0xa8] sm:$0xff] }
 0xd94   : > { %v1880_v53 = vld [vmem:[%s5181_s19 + $0xe8] sm:$0xff] }
 0xd95   : > { %v5330_v56 = vadd.f32 %v1819_v55, %v5200_v1  ;;  %v1852_v1 = vld [vmem:[%s5181_s19 + $0x8] sm:$0xff]  ;;  %v4177_v55 = vcombine.low %v1856_v45, %v1864_v46  ;;  %v4193_v0 = vcombine.low %v1872_v52, %v1880_v53  ;;  %v4734_v45 = vld [vmem:[%s5196_s15 + $0xf8] sm:$0xff]  }
 0xd96   : > { %v4169_v5 = vcombine.low %v1852_v1, %v1860_v3  ;;  %v4170_v6 = vcombine.high %v1852_v1, %v1860_v3  ;;  %v1873_v3 = vld [vmem:[%s5181_s19 + $0xb0] sm:$0xff]  ;;  %v4735_v46 = vld [vmem:[%s5196_s15 + $0x38] sm:$0xff]  }
 0xd97   : > { %v1823_v57 = vsel %vm752_vm1, %v5330_v56, 0.0  ;;  %v4196_v10 = vcombine.high %v1873_v3, %v1881_v4  ;;  %v4195_v12 = vcombine.low %v1873_v3, %v1881_v4 }
 0xd98   : > { %1824 = vadd.xlane.f32.xlu1 %v1823_v57  ;;  %2171 = vmatprep.subr.bf16.mxu0 %v4170_v6  ;;  %v4192_v57 = vcombine.high %v1871_v50, %v1879_v51  ;;  %v1882_v6 = vld [vmem:[%s5181_s19 + $0xf8] sm:$0xff]  ;;  %v5440_v50 = vld [vmem:[%s5186_s22 + $0x8] sm:$0xff] }
 0xd99   : > { %2172 = vmatpush1.bf16.msra.mxu0 %v4169_v5  ;;  %v1874_v5 = vld [vmem:[%s5181_s19 + $0xb8] sm:$0xff] }
 0xd9a   : > { %2173 = vmatprep.subr.bf16.mxu0 %v4186_v15  ;;  %v4198_v11 = vcombine.high %v1874_v5, %v1882_v6  ;;  %v4197_v13 = vcombine.low %v1874_v5, %v1882_v6  ;;  %v4706_v15 = vld [vmem:[%s5196_s15 + $0xc0] sm:$0xff]  }
 0xd9d   : > { %2174 = vmatpush1.bf16.msra.mxu0 %v4185_v14  ;;  %v4705_v14 = vld [vmem:[%s5196_s15 + $0x40] sm:$0xff]  }
 0xd9e   : > { %2253 = vmatprep.subr.bf16.mxu0 %v4174_v25  ;;  %v4715_v25 = vld [vmem:[%s5196_s15 + $0x10] sm:$0xff]  }
 0xe25   : > { %v1825_v58 = vpop.xlane.xlu1 %1824 }
 0xe26   : > { %v1826_v59 = vmul.f32 0.03125, %v1825_v58  ;;  %v4194_v58 = vcombine.high %v1872_v52, %v1880_v53  ;;  %v1897_v52 = vsub.s32 2, %v5251_v31  ;;  %v5449_v53 = vld [vmem:[%s5186_s22] sm:$0xff] }
 0xe28   : > { %v1827_v60 = vsub.f32 %v5330_v56, %v1826_v59  ;;  %v1857_v59 = vld [vmem:[%s5181_s19 + $0x30] sm:$0xff] }
 0xe2a   : > { %v1828_v61 = vmul.f32 %v1827_v60, %v1827_v60 }
 0xe2c   : > { %v1829_v62 = vsel %vm752_vm1, %v1828_v61, 0.0  ;;  %v1858_v61 = vld [vmem:[%s5181_s19 + $0x38] sm:$0xff] }
 0xe2d   : > { %1830 = vadd.xlane.f32.xlu0 %v1829_v62  ;;  %v1866_v62 = vld [vmem:[%s5181_s19 + $0x78] sm:$0xff] }
 0xe2e   : > { %v4182_v2 = vcombine.high %v1858_v61, %v1866_v62  ;;  %v4181_v8 = vcombine.low %v1858_v61, %v1866_v62 }
 0xeba   : > { %v1831_v26 = vpop.xlane.xlu0 %1830 }
 0xebb   : > { %v1832_v27 = vmul.f32 0.03125, %v1831_v26  ;;  %v4716_v26 = vld [vmem:[%s5196_s15 + $0x90] sm:$0xff]  }
 0xebd   : > { %v1833_v28 = vadd.f32 1e-05, %v1832_v27  ;;  %v4717_v27 = vld [vmem:[%s5196_s15 + $0x58] sm:$0xff]  }
 0xebf   : > { %4851 = vrsqrt.f32 %v1833_v28  ;;  %v4718_v28 = vld [vmem:[%s5196_s15 + $0xd8] sm:$0xff]  }
 0xec9   : > { %v4852_v29 = vpop.eup %4851 }
 0xeca   : > { %v1835_v33 = vmul.f32 %v4852_v29, %v1827_v60  ;;  %v1865_v60 = vld [vmem:[%s5181_s19 + $0x70] sm:$0xff]  ;;  %v4719_v29 = vld [vmem:[%s5196_s15 + $0x18] sm:$0xff]  }
 0xecb   : > { %v4180_v1 = vcombine.high %v1857_v59, %v1865_v60  ;;  %v4179_v7 = vcombine.low %v1857_v59, %v1865_v60 }
 0xecc   : > { %v1842_v36 = vmul.f32 %v4165_v30, %v1835_v33  ;;  %v4720_v30 = vld [vmem:[%s5196_s15 + $0x98] sm:$0xff]   ;;  %v4721_v33 = vld [vmem:[%s5196_s15 + $0x60] sm:$0xff]  }
 0xece   : > { %v1849_v41 = vadd.f32 %v4166_v35, %v1842_v36  ;;  %v4722_v35 = vld [vmem:[%s5196_s15 + $0xe0] sm:$0xff]  }
 0xecf   : > { %v4723_v36 = vld [vmem:[%s5196_s15 + $0x20] sm:$0xff]  }
 0xed0   : > { %v5364_v42 = vpack.c.bf16 %v1849_v41, %v1849_v41  ;;  %v4728_v41 = vld [vmem:[%s5196_s15 + $0xa8] sm:$0xff]  }
 0xed2   : > { %4199 = vmatmul.mubr.msk.bf16.vlgmr.msra.gmra.mrb[16].mxu1 %vm752_vm1, %v5364_v42  ;;  %4200 = vmatmul.mubr.msk.bf16.vlgmr.msra.gmra.mrb[16].mxu0 %vm752_vm1, %v5364_v42 }
 0xed3   : > { %2213 = vmatpush1.bf16.msra.mxu1 %v4171_v22  ;;  %2254 = vmatpush1.bf16.msra.mxu0 %v4173_v24  ;;  %v4713_v22 = vld [vmem:[%s5196_s15 + $0x50] sm:$0xff]  }
 0xed4   : > { %2214 = vmatprep.subr.bf16.mxu1 %v4188_v43  ;;  %2255 = vmatprep.subr.bf16.mxu0 %v4190_v9  ;;  %v4714_v24 = vld [vmem:[%s5196_s15 + $0xd0] sm:$0xff]  }
 0xed5   : > { %2244 = vmatprep.mubr.bf16.mxu1 %v4964_v19  ;;  %2285 = vmatprep.mubr.bf16.mxu0 %v4964_v19  ;;  %v4730_v43 = vld [vmem:[%s5196_s15 + $0xf0] sm:$0xff]  }
 0xed6   : > { %v4731_v9 = vld [vmem:[%s5196_s15 + $0x30] sm:$0xff]  }
 0xed7   : > { %2215 = vmatpush1.bf16.msra.mxu1 %v4187_v47  ;;  %2256 = vmatpush1.bf16.msra.mxu0 %v4189_v48  ;;  %v4736_v47 = vld [vmem:[%s5196_s15 + $0xb8] sm:$0xff]   ;;  %v4737_v48 = vld [vmem:[%s5196_s15 + $0x140] sm:$0xff]  }
 0xed8   : > { %2294 = vmatprep.subr.bf16.mxu1 %v4176_v23  ;;  %2335 = vmatprep.subr.bf16.mxu0 %v4178_v49  ;;  %v4738_v23 = vld [vmem:[%s5196_s15 + $0x1c0] sm:$0xff]   ;;  %v1913_v49 = vsub.s32 6, %v5251_v31 }
 0xeda   : > { %4201 = vmatmul.mubr.msk.bf16.vlgmr.msra.gmra.mrb[20].mxu1 %vm752_vm1, %v5364_v42  ;;  %4202 = vmatmul.mubr.msk.bf16.vlgmr.msra.gmra.mrb[20].mxu0 %vm752_vm1, %v5364_v42  ;;  %v5445_v51 = vrot.slane %v5440_v50, %v1913_v49 }
 0xedb   : > { %2295 = vmatpush1.bf16.msra.mxu1 %v4175_v54  ;;  %2336 = vmatpush1.bf16.msra.mxu0 %v4177_v55  ;;  %v1893_v54 = vsub.s32 1, %v5251_v31  ;;  %v1901_v55 = vsub.s32 3, %v5251_v31 }
 0xedc   : > { %2296 = vmatprep.subr.bf16.mxu1 %v4192_v57  ;;  %2337 = vmatprep.subr.bf16.mxu0 %v4194_v58  ;;  %v1890_v57 = vrot.slane %v5449_v53, %v5254_v32  ;;  %v1898_v58 = vrot.slane %v5449_v53, %v1897_v52 }
 0xedd   : > { %2326 = vmatprep.mubr.bf16.mxu1 %v4964_v19  ;;  %2367 = vmatprep.mubr.bf16.mxu0 %v4964_v19  ;;  %v1894_v59 = vrot.slane %v5449_v53, %v1893_v54  ;;  %v1902_v60 = vrot.slane %v5449_v53, %v1901_v55 }
 0xedf   : > { %2297 = vmatpush1.bf16.msra.mxu1 %v4191_v63  ;;  %2338 = vmatpush1.bf16.msra.mxu0 %v4193_v0 }
 0xee0   : > { %2376 = vmatprep.subr.bf16.mxu1 %v4180_v1  ;;  %2417 = vmatprep.subr.bf16.mxu0 %v4182_v2 }
 0xee2   : > { %4203 = vmatmul.mubr.msk.bf16.vlgmr.msra.gmra.mrb[24].mxu1 %vm752_vm1, %v5364_v42  ;;  %4204 = vmatmul.mubr.msk.bf16.vlgmr.msra.gmra.mrb[24].mxu0 %vm752_vm1, %v5364_v42 }
 0xee3   : > { %2377 = vmatpush1.bf16.msra.mxu1 %v4179_v7  ;;  %2418 = vmatpush1.bf16.msra.mxu0 %v4181_v8  ;;  %v1909_v7 = vsub.s32 5, %v5251_v31  ;;  %v1917_v8 = vsub.s32 7, %v5251_v31 }
 0xee4   : > { %2378 = vmatprep.subr.bf16.mxu1 %v4196_v10  ;;  %2419 = vmatprep.subr.bf16.mxu0 %v4198_v11 }
 0xee5   : > { %2408 = vmatprep.mubr.bf16.mxu1 %v4964_v19  ;;  %2449 = vmatprep.mubr.bf16.mxu0 %v4964_v19  ;;  %v4711_v19 = vld [vmem:[%s5196_s15 + $0x8] sm:$0xff]  }
 0xee7   : > { %2379 = vmatpush1.bf16.msra.mxu1 %v4195_v12  ;;  %2420 = vmatpush1.bf16.msra.mxu0 %v4197_v13 }
 0xee8   : > { %4374 = vmatprep.subr.bf16.mxu1 %v4705_v14  ;;  %4396 = vmatprep.subr.bf16.mxu0 %v4706_v15 }
 0xeea   : > { %4205 = vmatmul.mubr.msk.bf16.vlgmr.msra.gmra.mrb[28].mxu1 %vm752_vm1, %v5364_v42  ;;  %4206 = vmatmul.mubr.msk.bf16.vlgmr.msra.gmra.mrb[28].mxu0 %vm752_vm1, %v5364_v42  ;;  %v4729_v42 = vld [vmem:[%s5196_s15 + $0x70] sm:$0xff]  }
 0xeeb   : > { %4375 = vmatpush3.bf16.msra.mxu1 %v4707_v16  ;;  %4397 = vmatpush3.bf16.msra.mxu0 %v4708_v17 }
 0xeec   : > { %4376 = vmatprep.subr.bf16.mxu1 %v4709_v18  ;;  %4398 = vmatprep.subr.bf16.mxu0 %v4710_v20  ;;  %v1910_v18 = vrot.slane %v5449_v53, %v1909_v7  ;;  %v1918_v20 = vrot.slane %v5449_v53, %v1917_v8 }
 0xeef   : > { %4377 = vmatpush3.bf16.msra.mxu1 %v4711_v19  ;;  %4399 = vmatpush3.bf16.msra.mxu0 %v4712_v21 }
 0xef0   : > { %4378 = vmatprep.subr.bf16.mxu1 %v4713_v22  ;;  %4400 = vmatprep.subr.bf16.mxu0 %v4714_v24 }
 0xef3   : > { %4379 = vmatpush3.bf16.msra.mxu1 %v4715_v25  ;;  %4401 = vmatpush3.bf16.msra.mxu0 %v4716_v26  ;;  %v4739_v25 = vld [vmem:[%s5196_s15 + $0x100] sm:$0xff]  }
 0xef4   : > { %4380 = vmatprep.subr.bf16.mxu1 %v4717_v27  ;;  %4402 = vmatprep.subr.bf16.mxu0 %v4718_v28  ;;  %v4740_v26 = vld [vmem:[%s5196_s15 + $0x180] sm:$0xff]  }
 0xef7   : > { %4381 = vmatpush3.bf16.msra.mxu1 %v4719_v29  ;;  %4403 = vmatpush3.bf16.msra.mxu0 %v4720_v30 }
 0xef8   : > { %4382 = vmatprep.subr.bf16.mxu1 %v4721_v33  ;;  %4404 = vmatprep.subr.bf16.mxu0 %v4722_v35  ;;  %v4741_v33 = vld [vmem:[%s5196_s15 + $0x148] sm:$0xff]  }
 0xef9   : > { %v4742_v35 = vld [vmem:[%s5196_s15 + $0x1c8] sm:$0xff]  }
 0xefb   : > { %4383 = vmatpush3.bf16.msra.mxu1 %v4723_v36  ;;  %4405 = vmatpush3.bf16.msra.mxu0 %v4724_v37 }
 0xefc   : > { %4384 = vmatprep.subr.bf16.mxu1 %v4725_v38  ;;  %4406 = vmatprep.subr.bf16.mxu0 %v4726_v39 }
 0xeff   : > { %4385 = vmatpush3.bf16.msra.mxu1 %v4727_v40  ;;  %4407 = vmatpush3.bf16.msra.mxu0 %v4728_v41 }
 0xf00   : > { %4386 = vmatprep.subr.bf16.mxu1 %v4729_v42  ;;  %4408 = vmatprep.subr.bf16.mxu0 %v4730_v43  ;;  %v4743_v42 = vld [vmem:[%s5196_s15 + $0x108] sm:$0xff]  }
 0xf01   : > { %v4744_v43 = vld [vmem:[%s5196_s15 + $0x188] sm:$0xff]  }
 0xf03   : > { %4387 = vmatpush3.bf16.msra.mxu1 %v4731_v9  ;;  %4409 = vmatpush3.bf16.msra.mxu0 %v4732_v44  ;;  %v4745_v9 = vld [vmem:[%s5196_s15 + $0x150] sm:$0xff]  }
 0xf04   : > { %4388 = vmatprep.subr.bf16.mxu1 %v4733_v34  ;;  %4410 = vmatprep.subr.bf16.mxu0 %v4734_v45  ;;  %v4746_v44 = vld [vmem:[%s5196_s15 + $0x1d0] sm:$0xff]  }
 0xf07   : > { %4389 = vmatpush3.bf16.msra.mxu1 %v4735_v46  ;;  %4411 = vmatpush3.bf16.msra.mxu0 %v4736_v47 }
 0xf08   : > { %4418 = vmatprep.subr.bf16.mxu1 %v4737_v48  ;;  %4440 = vmatprep.subr.bf16.mxu0 %v4738_v23  ;;  %v1930_v48 = vrot.slane %v5440_v50, %v1897_v52 }
 0xfa5   : > { %v2164_v61 = vpop.f32.mrb[16].mxu1  ;;  %v2205_v62 = vpop.f32.mrb[16].mxu0 }
 0xfa6   : > { %v2165_v63 = vadd.f32 %v2164_v61, %v1890_v57  ;;  %v2206_v0 = vadd.f32 %v2205_v62, %v1898_v58  ;;  %v2166_v1 = vpop.f32.mrb[17].mxu1  ;;  %v2207_v2 = vpop.f32.mrb[17].mxu0  ;;  %v4748_v61 = vld [vmem:[%s5196_s15 + $0x190] sm:$0xff]  }
 0xfa7   : > { %v2167_v3 = vadd.f32 %v2166_v1, %v1894_v59  ;;  %v2208_v4 = vadd.f32 %v2207_v2, %v1902_v60  ;;  %v2168_v5 = vpop.f32.mrb[18].mxu1  ;;  %v2209_v6 = vpop.f32.mrb[18].mxu0  ;;  %v4747_v60 = vld [vmem:[%s5196_s15 + $0x110] sm:$0xff]   ;;  %v4750_v1 = vld [vmem:[%s5196_s15 + $0x1d8] sm:$0xff]  }
 0xfa8   : > { %vm2458_vm5 = vcmp.gt.f32.partialorder %v2165_v63, 0.0  ;;  %v2474_v10 = vmul.f32 0.01, %v2165_v63  ;;  %vm2460_vm6 = vcmp.gt.f32.partialorder %v2206_v0, 0.0  ;;  %v2476_v11 = vmul.f32 0.01, %v2206_v0 }
 0xfa9   : > { %vm2459_vm7 = vcmp.gt.f32.partialorder %v2167_v3, 0.0  ;;  %v2475_v12 = vmul.f32 0.01, %v2167_v3  ;;  %vm2461_vm8 = vcmp.gt.f32.partialorder %v2208_v4, 0.0  ;;  %v2477_v13 = vmul.f32 0.01, %v2208_v4 }
 0xfaa   : > { %v2490_v14 = vsel %vm2458_vm5, %v2165_v63, %v2474_v10  ;;  %v2492_v15 = vsel %vm2460_vm6, %v2206_v0, %v2476_v11  ;;  %v2169_v16 = vpop.f32.mrb[19].mxu1  ;;  %v2210_v17 = vpop.f32.mrb[19].mxu0  ;;  %v4749_v0 = vld [vmem:[%s5196_s15 + $0x158] sm:$0xff]   ;;  %v1905_v6 = vsub.s32 4, %v5251_v31  ;;  %v4796_v31 = vld [vmem:[%s5196_s15 + $0x2b0] sm:$0xff]  }
 0xfab   : > { %v2491_v19 = vsel %vm2459_vm7, %v2167_v3, %v2475_v12  ;;  %v2493_v21 = vsel %vm2461_vm8, %v2208_v4, %v2477_v13  ;;  %v2506_v27 = vpack.c.bf16 %v2490_v14, %v2490_v14  ;;  %v2508_v28 = vpack.c.bf16 %v2492_v15, %v2492_v15  ;;  %v4751_v10 = vld [vmem:[%s5196_s15 + $0x118] sm:$0xff]   ;;  %v4753_v12 = vld [vmem:[%s5196_s15 + $0x160] sm:$0xff]  }
 0xfac   : > { %v2507_v22 = vpack.c.bf16 %v2491_v19, %v2491_v19  ;;  %v2509_v24 = vpack.c.bf16 %v2493_v21, %v2493_v21  ;;  %v4752_v11 = vld [vmem:[%s5196_s15 + $0x198] sm:$0xff]   ;;  %v4754_v13 = vld [vmem:[%s5196_s15 + $0x1e0] sm:$0xff]   ;;  %v1938_v16 = vrot.slane %v5440_v50, %v1905_v6  ;;  %v4757_v21 = vld [vmem:[%s5196_s15 + $0x168] sm:$0xff]  }
 0xfad   : > { %v5474_v29 = vpop.f32.mrb[20].mxu1  ;;  %v5476_v30 = vpop.f32.mrb[20].mxu0  ;;  %v4755_v17 = vld [vmem:[%s5196_s15 + $0x120] sm:$0xff]  }
 0xfae   : > { %v2248_v36 = vpop.f32.mrb[21].mxu1  ;;  %v2289_v37 = vpop.f32.mrb[21].mxu0  ;;  %3585 = vmatprep.mubr.bf16.mxu1 %v2507_v22  ;;  %3625 = vmatprep.mubr.bf16.mxu0 %v2509_v24  ;;  %v4758_v22 = vld [vmem:[%s5196_s15 + $0x1e8] sm:$0xff]   ;;  %v1906_v24 = vrot.slane %v5449_v53, %v1905_v6 }
 0xfaf   : > { %v2249_v38 = vadd.f32 %v2248_v36, %v1910_v18  ;;  %v2290_v39 = vadd.f32 %v2289_v37, %v1918_v20  ;;  %v2250_v40 = vpop.f32.mrb[22].mxu1  ;;  %v2291_v41 = vpop.f32.mrb[22].mxu0  ;;  %3586 = vmatmul.mubr.bf16.vlgmr.msra.gmra.mrb[32].mxu1 %v2506_v27  ;;  %3626 = vmatmul.mubr.bf16.vlgmr.msra.gmra.mrb[32].mxu0 %v2508_v28  ;;  %v4756_v18 = vld [vmem:[%s5196_s15 + $0x1a0] sm:$0xff]   ;;  %v4774_v6 = vld [vmem:[%s5196_s15 + $0x2c8] sm:$0xff]  }
 0xfb0   : > { %4419 = vmatpush3.bf16.msra.mxu1 %v4739_v25  ;;  %4441 = vmatpush3.bf16.msra.mxu0 %v4740_v26  ;;  %v2251_v46 = vpop.f32.mrb[23].mxu1  ;;  %v2292_v47 = vpop.f32.mrb[23].mxu0  ;;  %v1914_v25 = vrot.slane %v5449_v53, %v1913_v49  ;;  %v1934_v49 = vrot.slane %v5440_v50, %v1901_v55  ;;  %v4760_v53 = vld [vmem:[%s5196_s15 + $0x1a8] sm:$0xff]  }
 0xfb1   : > { %vm2463_vm9 = vcmp.gt.f32.partialorder %v2249_v38, 0.0  ;;  %v2479_v34 = vmul.f32 0.01, %v2249_v38  ;;  %vm2465_vm10 = vcmp.gt.f32.partialorder %v2290_v39, 0.0  ;;  %v2481_v45 = vmul.f32 0.01, %v2290_v39  ;;  %4420 = vmatprep.subr.bf16.mxu1 %v4741_v33  ;;  %4442 = vmatprep.subr.bf16.mxu0 %v4742_v35 }
 0xfb2   : > { %v1926_v35 = vrot.slane %v5440_v50, %v1893_v54  ;;  %v2247_v54 = vadd.f32 %v5474_v29, %v1906_v24  ;;  %v2288_v40 = vadd.f32 %v5476_v30, %v1914_v25  ;;  %v4787_v24 = vld [vmem:[%s5196_s15 + $0x220] sm:$0xff]  }
 0xfb3   : > { %v2495_v23 = vsel %vm2463_vm9, %v2249_v38, %v2479_v34  ;;  %v2497_v57 = vsel %vm2465_vm10, %v2290_v39, %v2481_v45  ;;  %v4761_v38 = vld [vmem:[%s5196_s15 + $0x170] sm:$0xff]   ;;  %v4765_v34 = vld [vmem:[%s5196_s15 + $0x178] sm:$0xff]   ;;  %v4788_v25 = vld [vmem:[%s5196_s15 + $0x2a0] sm:$0xff]  }
 0xfb4   : > { %4421 = vmatpush3.bf16.msra.mxu1 %v4743_v42  ;;  %4443 = vmatpush3.bf16.msra.mxu0 %v4744_v43  ;;  %v2511_v58 = vpack.c.bf16 %v2495_v23, %v2495_v23  ;;  %v2513_v59 = vpack.c.bf16 %v2497_v57, %v2497_v57  ;;  %v4762_v39 = vld [vmem:[%s5196_s15 + $0x1f0] sm:$0xff]   ;;  %v4766_v45 = vld [vmem:[%s5196_s15 + $0x1f8] sm:$0xff]   ;;  %v2478_v46 = vmul.f32 0.01, %v2247_v54  ;;  %v2480_v29 = vmul.f32 0.01, %v2288_v40 }
 0xfb5   : > { %v5489_v62 = vpop.f32.mrb[24].mxu1  ;;  %v2369_v63 = vpop.f32.mrb[24].mxu0  ;;  %4422 = vmatprep.subr.bf16.mxu1 %v4745_v9  ;;  %4444 = vmatprep.subr.bf16.mxu0 %v4746_v44  ;;  %v4763_v9 = vld [vmem:[%s5196_s15 + $0x130] sm:$0xff]   ;;  %vm2462_vm11 = vcmp.gt.f32.partialorder %v2247_v54, 0.0  ;;  %vm2464_vm12 = vcmp.gt.f32.partialorder %v2288_v40, 0.0  ;;  %v4768_v23 = vld [vmem:[%s5196_s15 + $0x1b8] sm:$0xff]  }
 0xfb6   : > { %v5493_v52 = vadd.f32 %v2369_v63, %v1930_v48  ;;  %v2330_v2 = vpop.f32.mrb[25].mxu1  ;;  %v2371_v3 = vpop.f32.mrb[25].mxu0  ;;  %3665 = vmatprep.mubr.bf16.mxu1 %v2511_v58  ;;  %3705 = vmatprep.mubr.bf16.mxu0 %v2513_v59  ;;  %v4764_v44 = vld [vmem:[%s5196_s15 + $0x1b0] sm:$0xff]   ;;  %v4767_v48 = vld [vmem:[%s5196_s15 + $0x138] sm:$0xff]   ;;  %v4769_v57 = vld [vmem:[%s5196_s15 + $0x240] sm:$0xff]   ;;  %v2494_v59 = vsel %vm2462_vm11, %v2247_v54, %v2478_v46 }
 0xfb7   : > { %v2332_v4 = vpop.f32.mrb[26].mxu1  ;;  %v2373_v5 = vpop.f32.mrb[26].mxu0  ;;  %v2331_v43 = vadd.f32 %v2330_v2, %v1926_v35  ;;  %v2372_v55 = vadd.f32 %v2371_v3, %v1934_v49  ;;  %v4770_v58 = vld [vmem:[%s5196_s15 + $0x2c0] sm:$0xff]   ;;  %v4789_v35 = vld [vmem:[%s5196_s15 + $0x268] sm:$0xff]   ;;  %v1942_v49 = vrot.slane %v5440_v50, %v1909_v7  ;;  %v4794_v54 = vld [vmem:[%s5196_s15 + $0x2f0] sm:$0xff]  }
 0xfb8   : > { %4423 = vmatpush3.bf16.msra.mxu1 %v4747_v60  ;;  %4445 = vmatpush3.bf16.msra.mxu0 %v4748_v61  ;;  %v2333_v14 = vpop.f32.mrb[27].mxu1  ;;  %v2374_v15 = vpop.f32.mrb[27].mxu0  ;;  %v2496_v60 = vsel %vm2464_vm12, %v2288_v40, %v2480_v29  ;;  %v4771_v63 = vld [vmem:[%s5196_s15 + $0x200] sm:$0xff]   ;;  %v4773_v5 = vld [vmem:[%s5196_s15 + $0x248] sm:$0xff]   ;;  %v4795_v7 = vld [vmem:[%s5196_s15 + $0x230] sm:$0xff]   ;;  %vm2468_vm0 = vcmp.gt.f32.partialorder %v5493_v52, 0.0 }
 0xfb9   : > { %4424 = vmatprep.subr.bf16.mxu1 %v4749_v0  ;;  %4446 = vmatprep.subr.bf16.mxu0 %v4750_v1  ;;  %v2483_v30 = vmul.f32 0.01, %v2331_v43  ;;  %vm2467_vm13 = vcmp.gt.f32.partialorder %v2331_v43, 0.0  ;;  %v2485_v47 = vmul.f32 0.01, %v2372_v55  ;;  %vm2469_vm14 = vcmp.gt.f32.partialorder %v2372_v55, 0.0 }
 0xfba   : > { %v2510_v1 = vpack.c.bf16 %v2494_v59, %v2494_v59  ;;  %v2512_v2 = vpack.c.bf16 %v2496_v60, %v2496_v60  ;;  %v4772_v3 = vld [vmem:[%s5196_s15 + $0x280] sm:$0xff]   ;;  %v4778_v14 = vld [vmem:[%s5196_s15 + $0x2d0] sm:$0xff]   ;;  %v4806_v59 = vld [vmem:[%s5196_s15 + $0x3c8] sm:$0xff]  }
 0xfbb   : > { %v2499_v61 = vsel %vm2467_vm13, %v2331_v43, %v2483_v30  ;;  %v2501_v0 = vsel %vm2469_vm14, %v2372_v55, %v2485_v47  ;;  %v4779_v15 = vld [vmem:[%s5196_s15 + $0x210] sm:$0xff]   ;;  %v4799_v43 = vld [vmem:[%s5196_s15 + $0x238] sm:$0xff]   ;;  %v4803_v46 = vld [vmem:[%s5196_s15 + $0x300] sm:$0xff]  }
 0xfbc   : > { %4425 = vmatpush3.bf16.msra.mxu1 %v4751_v10  ;;  %4447 = vmatpush3.bf16.msra.mxu0 %v4752_v11  ;;  %v2515_v4 = vpack.c.bf16 %v2499_v61, %v2499_v61  ;;  %v2517_v10 = vpack.c.bf16 %v2501_v0, %v2501_v0  ;;  %v4775_v11 = vld [vmem:[%s5196_s15 + $0x208] sm:$0xff]   ;;  %v4800_v55 = vld [vmem:[%s5196_s15 + $0x2b8] sm:$0xff]   ;;  %v4804_v47 = vld [vmem:[%s5196_s15 + $0x380] sm:$0xff]  }
 0xfbd   : > { %v2410_v20 = vpop.f32.mrb[28].mxu1  ;;  %v2451_v19 = vpop.f32.mrb[28].mxu0  ;;  %4426 = vmatprep.subr.bf16.mxu1 %v4753_v12  ;;  %4448 = vmatprep.subr.bf16.mxu0 %v4754_v13  ;;  %v4776_v12 = vld [vmem:[%s5196_s15 + $0x288] sm:$0xff]   ;;  %v4777_v13 = vld [vmem:[%s5196_s15 + $0x250] sm:$0xff]  }
 0xfbe   : > { %v5509_v26 = vadd.f32 %v2410_v20, %v1938_v16  ;;  %v5512_v27 = vadd.f32 %v2451_v19, %v5445_v51  ;;  %v5514_v28 = vpop.f32.mrb[29].mxu1  ;;  %v5516_v33 = vpop.f32.mrb[29].mxu0  ;;  %v4759_v51 = vld [vmem:[%s5196_s15 + $0x128] sm:$0xff]   ;;  %v4780_v16 = vld [vmem:[%s5196_s15 + $0x290] sm:$0xff]   ;;  %v4783_v20 = vld [vmem:[%s5196_s15 + $0x218] sm:$0xff]  }
 0xfbf   : > { %v2414_v36 = vpop.f32.mrb[30].mxu1  ;;  %v2455_v37 = vpop.f32.mrb[30].mxu0  ;;  %v4784_v19 = vld [vmem:[%s5196_s15 + $0x298] sm:$0xff]   ;;  %v2413_v40 = vadd.f32 %v5514_v28, %v1942_v49  ;;  %v4807_v60 = vld [vmem:[%s5196_s15 + $0x308] sm:$0xff]   ;;  %v4810_v0 = vld [vmem:[%s5196_s15 + $0x3d0] sm:$0xff]  }
 0xfc0   : > { %4427 = vmatpush3.bf16.msra.mxu1 %v4755_v17  ;;  %4449 = vmatpush3.bf16.msra.mxu0 %v4756_v18  ;;  %v2415_v41 = vpop.f32.mrb[31].mxu1  ;;  %v2456_v42 = vpop.f32.mrb[31].mxu0  ;;  %v4781_v17 = vld [vmem:[%s5196_s15 + $0x258] sm:$0xff]   ;;  %v1922_v36 = vrot.slane %v5440_v50, %v5254_v32  ;;  %v4790_v37 = vld [vmem:[%s5196_s15 + $0x2e8] sm:$0xff]   ;;  %v4793_v32 = vld [vmem:[%s5196_s15 + $0x270] sm:$0xff]   ;;  %vm2470_vm4 = vcmp.gt.f32.partialorder %v5509_v26, 0.0 }
 0xfc1   : > { %4428 = vmatprep.subr.bf16.mxu1 %v4757_v21  ;;  %4450 = vmatprep.subr.bf16.mxu0 %v4758_v22  ;;  %v4782_v18 = vld [vmem:[%s5196_s15 + $0x2d8] sm:$0xff]   ;;  %v4785_v21 = vld [vmem:[%s5196_s15 + $0x260] sm:$0xff]   ;;  %v2487_v28 = vmul.f32 0.01, %v2413_v40  ;;  %vm2471_vm2 = vcmp.gt.f32.partialorder %v2413_v40, 0.0  ;;  %v4808_v61 = vld [vmem:[%s5196_s15 + $0x388] sm:$0xff]  }
 0xfc2   : > { %v4786_v22 = vld [vmem:[%s5196_s15 + $0x2e0] sm:$0xff]   ;;  %v4798_v42 = vld [vmem:[%s5196_s15 + $0x2f8] sm:$0xff]   ;;  %vm2472_vm5 = vcmp.gt.f32.partialorder %v5512_v27, 0.0 }
 0xfc3   : > { %v2503_v29 = vsel %vm2471_vm2, %v2413_v40, %v2487_v28 }
 0xfc4   : > { %4429 = vmatpush3.bf16.msra.mxu1 %v4759_v51  ;;  %4451 = vmatpush3.bf16.msra.mxu0 %v4760_v53  ;;  %v4791_v51 = vld [vmem:[%s5196_s15 + $0x228] sm:$0xff]   ;;  %v1950_v53 = vrot.slane %v5440_v50, %v1917_v8  ;;  %v4797_v50 = vld [vmem:[%s5196_s15 + $0x278] sm:$0xff]  }
 0xfc5   : > { %4430 = vmatprep.subr.bf16.mxu1 %v4761_v38  ;;  %4452 = vmatprep.subr.bf16.mxu0 %v4762_v39  ;;  %v4792_v38 = vld [vmem:[%s5196_s15 + $0x2a8] sm:$0xff]   ;;  %v2329_v39 = vadd.f32 %v5489_v62, %v1922_v36  ;;  %v2484_v62 = vmul.f32 0.01, %v5493_v52  ;;  %v4831_v36 = vld [vmem:[%s5196_s15 + $0x338] sm:$0xff]  }
 0xfc6   : > { %v2454_v41 = vadd.f32 %v5516_v33, %v1950_v53 }
 0xfc7   : > { %v2482_v8 = vmul.f32 0.01, %v2329_v39  ;;  %vm2466_vm15 = vcmp.gt.f32.partialorder %v2329_v39, 0.0 }
 0xfc8   : > { %4431 = vmatpush3.bf16.msra.mxu1 %v4763_v9  ;;  %4453 = vmatpush3.bf16.msra.mxu0 %v4764_v44  ;;  %v2489_v33 = vmul.f32 0.01, %v2454_v41  ;;  %v4801_v9 = vld [vmem:[%s5196_s15 + $0x340] sm:$0xff]   ;;  %vm2473_vm3 = vcmp.gt.f32.partialorder %v2454_v41, 0.0 }
 0xfc9   : > { %4432 = vmatprep.subr.bf16.mxu1 %v4765_v34  ;;  %4454 = vmatprep.subr.bf16.mxu0 %v4766_v45  ;;  %v2498_v44 = vsel %vm2466_vm15, %v2329_v39, %v2482_v8  ;;  %v4802_v34 = vld [vmem:[%s5196_s15 + $0x3c0] sm:$0xff]   ;;  %v2500_v45 = vsel %vm2468_vm0, %v5493_v52, %v2484_v62 }
 0xfca   : > { %v2514_v30 = vpack.c.bf16 %v2498_v44, %v2498_v44 }
 0xfcc   : > { %4433 = vmatpush3.bf16.msra.mxu1 %v4767_v48  ;;  %4455 = vmatpush3.bf16.msra.mxu0 %v4768_v23  ;;  %v2505_v48 = vsel %vm2473_vm3, %v2454_v41, %v2489_v33  ;;  %v2516_v23 = vpack.c.bf16 %v2500_v45, %v2500_v45 }
 0xfcd   : > { %4462 = vmatprep.subr.bf16.mxu1 %v4769_v57  ;;  %4484 = vmatprep.subr.bf16.mxu0 %v4770_v58  ;;  %v4805_v57 = vld [vmem:[%s5196_s15 + $0x348] sm:$0xff]   ;;  %v2519_v58 = vpack.c.bf16 %v2503_v29, %v2503_v29  ;;  %v2521_v52 = vpack.c.bf16 %v2505_v48, %v2505_v48 }
 0xfcf   : > { %3666 = vmatmul.mubr.bf16.vlgmr.msra.gmra.mrb[36].mxu1 %v2510_v1  ;;  %3706 = vmatmul.mubr.bf16.vlgmr.msra.gmra.mrb[36].mxu0 %v2512_v2  ;;  %v4811_v1 = vld [vmem:[%s5196_s15 + $0x310] sm:$0xff]  }
 0xfd0   : > { %4463 = vmatpush3.bf16.msra.mxu1 %v4771_v63  ;;  %3745 = vmatprep.mubr.bf16.mxu1 %v2515_v4  ;;  %v4809_v63 = vld [vmem:[%s5196_s15 + $0x350] sm:$0xff]   ;;  %v4814_v4 = vld [vmem:[%s5196_s15 + $0x3d8] sm:$0xff]  }
 0xfd1   : > { %4485 = vmatpush3.bf16.msra.mxu0 %v4772_v3  ;;  %3785 = vmatprep.mubr.bf16.mxu0 %v2517_v10  ;;  %v4812_v2 = vld [vmem:[%s5196_s15 + $0x390] sm:$0xff]   ;;  %v4813_v3 = vld [vmem:[%s5196_s15 + $0x358] sm:$0xff]   ;;  %v4817_v10 = vld [vmem:[%s5196_s15 + $0x360] sm:$0xff]  }
 0xfd2   : > { %4464 = vmatprep.subr.bf16.mxu1 %v4773_v5  ;;  %4486 = vmatprep.subr.bf16.mxu0 %v4774_v6  ;;  %v4815_v5 = vld [vmem:[%s5196_s15 + $0x318] sm:$0xff]  }
 0xfd3   : > { %v4816_v6 = vld [vmem:[%s5196_s15 + $0x398] sm:$0xff]  }
 0xfd4   : > { %4465 = vmatpush3.bf16.msra.mxu1 %v4775_v11  ;;  %v4818_v11 = vld [vmem:[%s5196_s15 + $0x3e0] sm:$0xff]  }
 0xfd5   : > { %4487 = vmatpush3.bf16.msra.mxu0 %v4776_v12  ;;  %4466 = vmatprep.subr.bf16.mxu1 %v4777_v13  ;;  %v4819_v12 = vld [vmem:[%s5196_s15 + $0x320] sm:$0xff]  }
 0xfd6   : > { %4488 = vmatprep.subr.bf16.mxu0 %v4778_v14  ;;  %v4820_v13 = vld [vmem:[%s5196_s15 + $0x3a0] sm:$0xff]   ;;  %v4821_v14 = vld [vmem:[%s5196_s15 + $0x368] sm:$0xff]  }
 0xfd8   : > { %4467 = vmatpush3.bf16.msra.mxu1 %v4779_v15  ;;  %v4822_v15 = vld [vmem:[%s5196_s15 + $0x3e8] sm:$0xff]  }
 0xfd9   : > { %4489 = vmatpush3.bf16.msra.mxu0 %v4780_v16  ;;  %4468 = vmatprep.subr.bf16.mxu1 %v4781_v17  ;;  %v4823_v16 = vld [vmem:[%s5196_s15 + $0x328] sm:$0xff]  }
 0xfda   : > { %4490 = vmatprep.subr.bf16.mxu0 %v4782_v18  ;;  %v4824_v17 = vld [vmem:[%s5196_s15 + $0x3a8] sm:$0xff]   ;;  %v4825_v18 = vld [vmem:[%s5196_s15 + $0x370] sm:$0xff]  }
 0xfdc   : > { %4469 = vmatpush3.bf16.msra.mxu1 %v4783_v20  ;;  %v4826_v20 = vld [vmem:[%s5196_s15 + $0x3f0] sm:$0xff]  }
 0xfdd   : > { %4491 = vmatpush3.bf16.msra.mxu0 %v4784_v19  ;;  %4470 = vmatprep.subr.bf16.mxu1 %v4785_v21  ;;  %v4827_v19 = vld [vmem:[%s5196_s15 + $0x330] sm:$0xff]  }
 0xfde   : > { %4492 = vmatprep.subr.bf16.mxu0 %v4786_v22  ;;  %v4828_v21 = vld [vmem:[%s5196_s15 + $0x3b0] sm:$0xff]   ;;  %v4829_v22 = vld [vmem:[%s5196_s15 + $0x378] sm:$0xff]  }
 0xfe0   : > { %4471 = vmatpush3.bf16.msra.mxu1 %v4787_v24  ;;  %v2486_v24 = vmul.f32 0.01, %v5509_v26 }
 0xfe1   : > { %4493 = vmatpush3.bf16.msra.mxu0 %v4788_v25  ;;  %4472 = vmatprep.subr.bf16.mxu1 %v4789_v35  ;;  %v4830_v25 = vld [vmem:[%s5196_s15 + $0x3f8] sm:$0xff]   ;;  %v2488_v35 = vmul.f32 0.01, %v5512_v27 }
 0xfe2   : > { %4494 = vmatprep.subr.bf16.mxu0 %v4790_v37  ;;  %v4832_v37 = vld [vmem:[%s5196_s15 + $0x3b8] sm:$0xff]   ;;  %v2502_v49 = vsel %vm2470_vm4, %v5509_v26, %v2486_v24 }
 0xfe3   : > { %v2518_v53 = vpack.c.bf16 %v2502_v49, %v2502_v49  ;;  %v4337_v49 = vld [vmem:[%s5773_s28] ss:$0 sm:$0xff] (!%p4336_p1) }
 0xfe4   : > { %4473 = vmatpush3.bf16.msra.mxu1 %v4791_v51  ;;  %v2504_v51 = vsel %vm2472_vm5, %v5512_v27, %v2488_v35 }
 0xfe5   : > { %4495 = vmatpush3.bf16.msra.mxu0 %v4792_v38  ;;  %4474 = vmatprep.subr.bf16.mxu1 %v4793_v32  ;;  %v2520_v38 = vpack.c.bf16 %v2504_v51, %v2504_v51 }
 0xfe6   : > { %4496 = vmatprep.subr.bf16.mxu0 %v4794_v54  ;;  %v4207_v54 = vld [vmem:[%s737_s25] ss:$0 sm:$0xff] }
 0xfe8   : > { %4475 = vmatpush3.bf16.msra.mxu1 %v4795_v7 }
 0xfe9   : > { %4497 = vmatpush3.bf16.msra.mxu0 %v4796_v31  ;;  %4476 = vmatprep.subr.bf16.mxu1 %v4797_v50 }
 0xfea   : > { %4498 = vmatprep.subr.bf16.mxu0 %v4798_v42 }
 0xfec   : > { %4477 = vmatpush3.bf16.msra.mxu1 %v4799_v43 }
 0xfed   : > { %4499 = vmatpush3.bf16.msra.mxu0 %v4800_v55  ;;  %4506 = vmatprep.subr.bf16.mxu1 %v4801_v9 }
 0xfee   : > { %4528 = vmatprep.subr.bf16.mxu0 %v4802_v34 }
 0xfef   : > { %3746 = vmatmul.mubr.bf16.vlgmr.msra.gmra.mrb[40].mxu1 %v2514_v30 }
 0xff0   : > { %3786 = vmatmul.mubr.bf16.vlgmr.msra.gmra.mrb[40].mxu0 %v2516_v23  ;;  %4507 = vmatpush3.bf16.msra.mxu1 %v4803_v46 }
 0xff1   : > { %3825 = vmatprep.mubr.bf16.mxu1 %v2519_v58  ;;  %4529 = vmatpush3.bf16.msra.mxu0 %v4804_v47 }
 0xff2   : > { %3865 = vmatprep.mubr.bf16.mxu0 %v2521_v52  ;;  %4508 = vmatprep.subr.bf16.mxu1 %v4805_v57 }
 0xff3   : > { %4530 = vmatprep.subr.bf16.mxu0 %v4806_v59 }
 0xff4   : > { %4509 = vmatpush3.bf16.msra.mxu1 %v4807_v60 }
 0xff5   : > { %4531 = vmatpush3.bf16.msra.mxu0 %v4808_v61  ;;  %4510 = vmatprep.subr.bf16.mxu1 %v4809_v63 }
 0xff6   : > { %4532 = vmatprep.subr.bf16.mxu0 %v4810_v0 }
 0xff8   : > { %4511 = vmatpush3.bf16.msra.mxu1 %v4811_v1 }
 0xff9   : > { %4533 = vmatpush3.bf16.msra.mxu0 %v4812_v2  ;;  %4512 = vmatprep.subr.bf16.mxu1 %v4813_v3 }
 0xffa   : > { %4534 = vmatprep.subr.bf16.mxu0 %v4814_v4 }
 0xffc   : > { %4513 = vmatpush3.bf16.msra.mxu1 %v4815_v5 }
 0xffd   : > { %4535 = vmatpush3.bf16.msra.mxu0 %v4816_v6  ;;  %4514 = vmatprep.subr.bf16.mxu1 %v4817_v10 }
 0xffe   : > { %4536 = vmatprep.subr.bf16.mxu0 %v4818_v11 }
0x1000   : > { %4515 = vmatpush3.bf16.msra.mxu1 %v4819_v12 }
0x1001   : > { %4537 = vmatpush3.bf16.msra.mxu0 %v4820_v13  ;;  %4516 = vmatprep.subr.bf16.mxu1 %v4821_v14 }
0x1002   : > { %4538 = vmatprep.subr.bf16.mxu0 %v4822_v15 }
0x1004   : > { %4517 = vmatpush3.bf16.msra.mxu1 %v4823_v16 }
0x1005   : > { %4539 = vmatpush3.bf16.msra.mxu0 %v4824_v17  ;;  %4518 = vmatprep.subr.bf16.mxu1 %v4825_v18 }
0x1006   : > { %4540 = vmatprep.subr.bf16.mxu0 %v4826_v20 }
0x1008   : > { %4519 = vmatpush3.bf16.msra.mxu1 %v4827_v19 }
0x1009   : > { %4541 = vmatpush3.bf16.msra.mxu0 %v4828_v21  ;;  %4520 = vmatprep.subr.bf16.mxu1 %v4829_v22 }
0x100a   : > { %4542 = vmatprep.subr.bf16.mxu0 %v4830_v25 }
0x100c   : > { %4521 = vmatpush3.bf16.msra.mxu1 %v4831_v36 }
0x100d   : > { %4543 = vmatpush3.bf16.msra.mxu0 %v4832_v37 }
0x100f   : > { %3826 = vmatmul.mubr.bf16.vlgmr.msra.gmra.mrb[44].mxu1 %v2518_v53  ;;  %v4338_v53 = vld [vmem:[%s5774_s16] ss:$0 sm:$0xff] (!%p4336_p1) }
0x1010   : > { %3866 = vmatmul.mubr.bf16.vlgmr.msra.gmra.mrb[44].mxu0 %v2520_v38 }
0x1082   : > { %v4390_v32 = vpop.f32.mrb[32].mxu1  ;;  %v4412_v39 = vpop.f32.mrb[32].mxu0 }
0x1083   : > { %v4391_v40 = vpop.f32.mrb[33].mxu1  ;;  %v4413_v7 = vpop.f32.mrb[33].mxu0 }
0x1084   : > { %v4392_v41 = vadd.f32 %v4391_v40, %v4390_v32  ;;  %v4414_v26 = vadd.f32 %v4413_v7, %v4412_v39  ;;  %v4393_v31 = vpop.f32.mrb[34].mxu1  ;;  %v4415_v50 = vpop.f32.mrb[34].mxu0 }
0x1085   : > { %v4394_v27 = vpop.f32.mrb[35].mxu1  ;;  %v4416_v8 = vpop.f32.mrb[35].mxu0 }
0x1086   : > { %v3588_v42 = vadd.f32 %v4392_v41, %v4207_v54 }
0x1088   : > { %v3628_v62 = vadd.f32 %v4414_v26, %v3588_v42 }
0x10a2   : > { %v4434_v28 = vpop.f32.mrb[36].mxu1  ;;  %v4456_v43 = vpop.f32.mrb[36].mxu0 }
0x10a3   : > { %v4435_v33 = vpop.f32.mrb[37].mxu1  ;;  %v4457_v55 = vpop.f32.mrb[37].mxu0 }
0x10a4   : > { %v4436_v9 = vadd.f32 %v4435_v33, %v4434_v28  ;;  %v4458_v44 = vadd.f32 %v4457_v55, %v4456_v43  ;;  %v4437_v34 = vpop.f32.mrb[38].mxu1  ;;  %v4459_v45 = vpop.f32.mrb[38].mxu0 }
0x10a5   : > { %v4438_v46 = vpop.f32.mrb[39].mxu1  ;;  %v4460_v29 = vpop.f32.mrb[39].mxu0 }
0x10a6   : > { %v3668_v30 = vadd.f32 %v4436_v9, %v3628_v62 }
0x10a8   : > { %v3708_v47 = vadd.f32 %v4458_v44, %v3668_v30 }
0x10c2   : > { %v4478_v48 = vpop.f32.mrb[40].mxu1 }
0x10c3   : > { %v4500_v23 = vpop.f32.mrb[40].mxu0  ;;  %v4479_v57 = vpop.f32.mrb[41].mxu1 }
0x10c4   : > { %v4480_v58 = vadd.f32 %v4479_v57, %v4478_v48  ;;  %v4501_v59 = vpop.f32.mrb[41].mxu0  ;;  %v4481_v52 = vpop.f32.mrb[42].mxu1 }
0x10c5   : > { %v4502_v60 = vadd.f32 %v4501_v59, %v4500_v23  ;;  %v4503_v61 = vpop.f32.mrb[42].mxu0  ;;  %v4482_v63 = vpop.f32.mrb[43].mxu1 }
0x10c6   : > { %v3748_v0 = vadd.f32 %v4480_v58, %v3708_v47  ;;  %v4504_v1 = vpop.f32.mrb[43].mxu0 }
0x10c8   : > { %v3788_v2 = vadd.f32 %v4502_v60, %v3748_v0 }
0x10e2   : > { %v4522_v3 = vpop.f32.mrb[44].mxu1 }
0x10e3   : > { %v4544_v4 = vpop.f32.mrb[44].mxu0  ;;  %v4523_v5 = vpop.f32.mrb[45].mxu1 }
0x10e4   : > { %v4524_v6 = vadd.f32 %v4523_v5, %v4522_v3  ;;  %v4545_v10 = vpop.f32.mrb[45].mxu0  ;;  %v4525_v11 = vpop.f32.mrb[46].mxu1 }
0x10e5   : > { %v4546_v12 = vadd.f32 %v4545_v10, %v4544_v4  ;;  %v4547_v13 = vpop.f32.mrb[46].mxu0  ;;  %v4526_v14 = vpop.f32.mrb[47].mxu1 }
0x10e6   : > { %v3828_v15 = vadd.f32 %v4524_v6, %v3788_v2  ;;  %v4548_v16 = vpop.f32.mrb[47].mxu0  ;;  %3878 = sbr.rel (%p4336_p1) target bundleno = 4646 (0x1226), region = 92 }
0x10e8   : > { %v3868_v17 = vadd.f32 %v4546_v12, %v3828_v15 }
0x10ea   : > { %v3873_v18 = vadd.f32 %v3868_v17, %v5330_v56 }
0x10ec   : > { %3874 = vst.msk [vmem:[#allocation2] sm:$0xff] %vm752_vm1, %v3873_v18  ;;  %v3881_v20 = vsel (!%p4336_p1), %vm752_vm1, %v3873_v18, 0.0 }
0x10ed   : > { %3882 = vadd.xlane.f32.xlu0 %v3881_v20 }
0x117a   : > { %v3883_v19 = vpop.xlane.xlu0 %3882 }
0x117b   : > { %v3884_v21 = vmul.f32 0.03125, %v3883_v19 }
0x117d   : > { %v3885_v22 = vsub.f32 %v3873_v18, %v3884_v21 }
0x117f   : > { %v3886_v24 = vmul.f32 %v3885_v22, %v3885_v22 }
0x1181   : > { %v3887_v25 = vsel %vm752_vm1, %v3886_v24, 0.0 }
0x1182   : > { %3888 = vadd.xlane.f32.xlu0 %v3887_v25 }
0x120f   : > { %v3889_v35 = vpop.xlane.xlu0 %3888 }
0x1210   : > { %v3890_v36 = vmul.f32 0.03125, %v3889_v35 }
0x1212   : > { %v3891_v37 = vadd.f32 1e-05, %v3890_v36 }
0x1214   : > { %4853 = vrsqrt.f32 %v3891_v37 }
0x121e   : > { %v4854_v56 = vpop.eup %4853 }
0x121f   : > { %v3893_v51 = vmul.f32 %v4854_v56, %v3885_v22 }
0x1221   : > { %v3900_v38 = vmul.f32 %v4337_v49, %v3893_v51 }
0x1223   : > { %v3907_v32 = vadd.f32 %v4338_v53, %v3900_v38 }
0x1225   : > { %3908 = vst.msk [vmem:[%s685_s1] sm:$0xff] %vm752_vm1, %v3907_v32 }
0x1226 PF: > { %s5775_s14 = sld [smem:[#allocation10_spill]]  ;;  %s5776_s27 = sld [smem:[#allocation7_spill]] }
0x1227   : > { %s5778_s21 = sld [smem:[#allocation29_spill]]  ;;  %s3923_s6 = sshll.u32 %s685_s1, 4  ;;  %s3924_s6 = int_to_ptr.vmem [resolvable:$true] %s3923_s6 }
0x1228   : > { %s4855_s19 = scalar_lea.vmem %s3924_s6, 128  ;;  %s4965_s22 = smov [#allocation3]  }
0x1229   : > { %p4856_p2 = scmp.ne.s32.totalorder %s3924_s6, %s4855_s19  ;;  %s4859_s24 = sshll.u32 %s4965_s22, 4  ;;  %s4860_s24 = int_to_ptr.vmem [resolvable:$false] %s4859_s24 }
0x122a   : > { %s4861_s20 = scalar_lea.vmem %s4860_s24, 256  ;;  %p4862_p6 = scmp.lt.s32.totalorder %s3924_s6, %s4860_s24 }
0x122b   : > { %p4857_p4 = pnand %p4856_p2, %p5100_p3  ;;  %p4863_p7 = scmp.lt.s32.totalorder %s4861_s20, %s4855_s19 }
0x122c   : > { %s4340_s0 = sshll.u32 %s5775_s14, 7  ;;  %s5780_s8 = sand.u32 1, %s5776_s27  }
0x122d   : > { %s5779_s18 = smov %s5778_s21  ;;  %s5643_s2 = scalar_lea.hbm %s5778_s21, %s4340_s0 }
0x122e   : > { %s3910_s11 = scalar_lea.sflag [#allocation4], %s5780_s8  ;;  %p4858_p5 = pneg %p4857_p4 }
0x122f   : > { %p4864_p8 = por %p4863_p7, %p4862_p6 }
0x1231   : > { %p4865_p10 = pnand %p4864_p8, %p4858_p5 }
0x1233   : > { %4868 = shalt.err (!%p4865_p10)
}
0x1234   : > { %s4869_s1 = scalar_lea.hbm %s5643_s2, 128  ;;  %s4873_s15 = scalar_lea.hbm %s5779_s18, 256 }
0x1235   : > { %p4870_p11 = scmp.ne.s32.totalorder %s5643_s2, %s4869_s1  ;;  %p4874_p0 = scmp.lt.u32.totalorder %s5643_s2, %s5779_s18 }
0x1236   : > { %p4875_p1 = scmp.lt.u32.totalorder %s4873_s15, %s4869_s1  ;;  %p4877_p4 = scmp.lt.u32.totalorder %s4869_s1, %s5643_s2 }
0x1237   : > { %p4871_p12 = pnand %p4870_p11, %p5100_p3 }
0x1238   : > { %p4876_p2 = por %p4875_p1, %p4874_p0 }
0x1239   : > { %p4872_p13 = pneg %p4871_p12 }
0x123a   : > { %p4878_p5 = por %p4877_p4, %p4876_p2 }
0x123c   : > { %p4879_p6 = pnand %p4878_p5, %p4872_p13 }
0x123e   : > { %4882 = shalt.err (!%p4879_p6)
}
0x123f   : > { %4618 = dma.vmem_to_hbm [thread:$0]  (%p5100_p3), %s3924_s6, 128, %s5643_s2, %s3910_s11  }
0x1240 PF: > { %s5781_s23 = sld [smem:[#allocation13_spill]]  ;;  %s5782_s16 = sld [smem:[#allocation6_spill]] }
0x1246   : > { %p4624_p7 = scmp.ge.s32.totalorder %s5781_s23, 2  ;;  %s3935_s27 = sand.u32 1, %s5782_s16  }
0x1247   : > { %s3936_s0 = scalar_lea.sflag [#allocation4], %s3935_s27 }
0x1248   : > { %p4621_p8 = pnand %p4624_p7, %p5110_p9 }
0x124a   : > { %4916 = dma.done.wait (!%p4621_p8), %s3936_s0, 128  }
0x124b   : > { %4918 = vsyncadd (!%p4621_p8), %s3936_s0, 4294967168  ;;  %s29_s28 = sadd.s32 1, %s5781_s23   ;;  %s5784_s21 = sld [smem:[#allocation7_spill]] }
0x124c   : > { %p26_p10 = scmp.ge.s32.totalorder %s29_s28, 6   ;;  %s5785_s22 = sld [smem:[#allocation8_spill]] }
0x124d   : > { %s5786_s23 = sld [smem:[#allocation18_spill]]  ;;  %s5787_s24 = sld [smem:[#allocation11_spill]] }
0x124e   : > { %s5788_s25 = sld [smem:[#allocation12_spill]]  ;;  %s5789_s26 = sld [smem:[#allocation14_spill]] }
0x124f   : > { %s5790_s27 = sld [smem:[#allocation16_spill]]  ;;  %28 = sbr.rel (!%p26_p10) target bundleno = 16 (0x10), region = 166 }
0x1256   :  { %3941 = vsyncpa [#allocation4], 1 }
0x1257   :  { %3943 = vsyncpa [#allocation4 + $0x1], 1 }

</bundles_post_ra>
